<compile_context>
chip_gen: v6e
topology: v6e:2x2x1
jax: 0.10.0
libtpu: 0.0.40
codegen_flags: <defaults>
</compile_context>

<pallas_src>
import jax
import jax.numpy as jnp
from jax.experimental import pallas as pl
from jax.experimental.pallas import tpu as pltpu

NF_RELU_GAMMA = 1.7128585577011108  # NF-net style variance-preserving ReLU gain
LOGITS_PAD = 1024                   # 1000-dim backbone logits padded to a lane multiple
STEM_CH = 128                       # stem channels = 128 keeps channels lane-dense


def _round_up(x, m):
    return -(-x // m) * m


# ----------------------------------------------------------------------------
# Fused kernel: per tile of TB images —
#   fori_loop{ MXU 3x3-conv-as-matmul + gamma*ReLU + GAP row into VMEM scratch }
#   then 1000-way head + ffn matmuls once per tile with M=TB.
# ----------------------------------------------------------------------------
def _encoder_kernel(p_ref, wc_ref, bc_ref, wfc_ref, bfc_ref, wffn_ref, bffn_ref,
                    o_ref, pooled_ref):
    # p_ref     : (TB, HW, KT) f32  halo-free conv patches, KT = 9*Cin padded to 8x
    # wc_ref    : (KT, CS)     f32  conv taps (zero rows beyond 9*Cin)
    # bc_ref    : (1, CS)      f32
    # wfc_ref   : (CS, 1024)   bf16 classifier head (1000 classes, zero-padded cols)
    # bfc_ref   : (1, 1024)    f32
    # wffn_ref  : (1024, PE)   f32  ffn weight (zero rows beyond 1000)
    # bffn_ref  : (1, PE)      f32
    # o_ref     : (TB, PE)     f32  lane-dense output block
    # pooled_ref: (TB, CS)     f32  VMEM scratch of pooled stem features
    TB, HW, _ = p_ref.shape
    inv_hw = 1.0 / float(HW)

    wc = wc_ref[...]          # hoisted out of the loop (tiny, stays resident)
    bc = bc_ref[...]          # (1, CS): broadcasts over sublanes (cheap direction)

    def body(i, carry):
        # (HW, KT) @ (KT, CS) -> (HW, CS): MXU conv, channels land on lanes.
        acc = jnp.dot(p_ref[i], wc, preferred_element_type=jnp.float32)
        act = jnp.maximum(acc + bc, 0.0) * NF_RELU_GAMMA          # NF scaled ReLU
        # Global average pool = sublane reduction -> (1, CS) row, no relayout.
        pooled_ref[pl.ds(i, 1), :] = jnp.sum(act, axis=0, keepdims=True) * inv_hw
        return carry

    jax.lax.fori_loop(0, TB, body, 0)

    pooled = pooled_ref[...]                                       # (TB, CS) f32
    # Classifier head: bf16 weights, f32 accumulation.
    logits = jnp.dot(pooled.astype(jnp.bfloat16), wfc_ref[...],
                     preferred_element_type=jnp.float32) + bfc_ref[...]
    # ffn: keep the bias-adjusted logits (and weights) in f32.
    out = jnp.dot(logits, wffn_ref[...],
                  preferred_element_type=jnp.float32) + bffn_ref[...]
    o_ref[...] = out


# ----------------------------------------------------------------------------
# Parameter construction (deterministic, synthetic backbone weights)
# ----------------------------------------------------------------------------
def init_params(key, *, in_chans=1, stem_ch=STEM_CH, embed_dim=32, prefix_tokens=8):
    k1, k2, k3, k4, k5, k6 = jax.random.split(key, 6)
    CS = stem_ch
    PE = embed_dim * prefix_tokens

    w_conv = jax.random.normal(k1, (in_chans * 9, CS), jnp.float32) * (
        1.0 / jnp.sqrt(9.0 * in_chans))
    b_conv = jax.random.normal(k2, (1, CS), jnp.float32) * 0.01

    # classifier head: CS -> 1000 (mimics the backbone's 1000-class output),
    # zero-padded to 1024 columns for lane alignment (padding is a math no-op).
    w_fc = jax.random.normal(k3, (CS, 1000), jnp.float32) * (1.0 / jnp.sqrt(float(CS)))
    b_fc = jax.random.normal(k4, (1, 1000), jnp.float32) * 0.01
    w_fc = jnp.pad(w_fc, ((0, 0), (0, LOGITS_PAD - 1000)))
    b_fc = jnp.pad(b_fc, ((0, 0), (0, LOGITS_PAD - 1000)))

    # ffn: nn.Linear(1000, embed_dim * prefix_tokens); contraction dim padded to
    # 1024 with zero rows so the padded logit lanes contribute nothing.
    w_ffn = jax.random.normal(k5, (1000, PE), jnp.float32) * (1.0 / jnp.sqrt(1000.0))
    b_ffn = jax.random.normal(k6, (1, PE), jnp.float32) * 0.01
    w_ffn = jnp.pad(w_ffn, ((0, LOGITS_PAD - 1000), (0, 0)))

    return {
        "w_conv": w_conv,                       # f32
        "b_conv": b_conv,                       # f32
        "w_fc": w_fc.astype(jnp.bfloat16),      # bf16 storage, f32 accumulation
        "b_fc": b_fc,                           # f32
        "w_ffn": w_ffn,                         # f32 (keeps ffn input full precision)
        "b_ffn": b_ffn,                         # f32
    }


# ----------------------------------------------------------------------------
# Forward pass
# ----------------------------------------------------------------------------
def image_encoder_forward(img_nchw, params, *, embed_dim=32, prefix_tokens=8):
    """img_nchw: (B, Cin, H, W) float32 (PyTorch NCHW convention)."""
    B, Cin, H, W = img_nchw.shape
    HW = H * W
    assert HW % 8 == 0, "H*W must be a multiple of 8 (sublane axis)"

    CS = params["w_conv"].shape[1]
    LOG = params["w_fc"].shape[1]
    PE = params["w_ffn"].shape[1]
    assert params["w_conv"].shape[0] == Cin * 9
    assert params["w_ffn"].shape[0] == LOG
    assert PE == embed_dim * prefix_tokens

    KT = _round_up(Cin * 9, 8)                  # tap axis padded to a sublane multiple
    TB = min(32, _round_up(B, 8))               # images per grid step (VMEM-safe cap)
    B_pad = _round_up(B, TB)

    # Cheap XLA glue: halo-free im2col (~9x the image bytes, contiguous HBM reads).
    # patches[b, y*W + x, (c*3+ky)*3+kx] = padded_img[b, c, y+ky, x+kx]
    xp = jnp.pad(img_nchw.astype(jnp.float32), ((0, 0), (0, 0), (1, 1), (1, 1)))
    taps = []
    for c in range(Cin):
        for ky in range(3):
            for kx in range(3):
                taps.append(xp[:, c, ky:ky + H, kx:kx + W].reshape(B, HW))
    patches = jnp.stack(taps, axis=-1)                            # (B, HW, 9*Cin)
    patches = jnp.pad(patches, ((0, B_pad - B), (0, 0), (0, KT - Cin * 9)))

    w_conv = jnp.pad(params["w_conv"], ((0, KT - Cin * 9), (0, 0)))  # (KT, CS)

    flat = pl.pallas_call(
        _encoder_kernel,
        out_shape=jax.ShapeDtypeStruct((B_pad, PE), jnp.float32),
        grid=(B_pad // TB,),
        in_specs=[
            pl.BlockSpec((TB, HW, KT), lambda t: (t, 0, 0)),   # patches (per tile)
            pl.BlockSpec((KT, CS), lambda t: (0, 0)),          # conv taps (resident)
            pl.BlockSpec((1, CS), lambda t: (0, 0)),           # conv bias
            pl.BlockSpec((CS, LOG), lambda t: (0, 0)),         # fc weight (bf16)
            pl.BlockSpec((1, LOG), lambda t: (0, 0)),          # fc bias
            pl.BlockSpec((LOG, PE), lambda t: (0, 0)),         # ffn weight (f32)
            pl.BlockSpec((1, PE), lambda t: (0, 0)),           # ffn bias
        ],
        out_specs=pl.BlockSpec((TB, PE), lambda t: (t, 0)),
        scratch_shapes=[pltpu.VMEM((TB, CS), jnp.float32)],    # pooled stem features
        compiler_params=pltpu.CompilerParams(
            dimension_semantics=("parallel",),     # batch tiles shard across TCs
            vmem_limit_bytes=32 * 1024 * 1024,
        ),
    )(patches, w_conv, params["b_conv"], params["w_fc"], params["b_fc"],
      params["w_ffn"], params["b_ffn"])

    # .view(-1, prefix_tokens, embed_dim)
    return flat[:B].reshape(-1, prefix_tokens, embed_dim)


# ----------------------------------------------------------------------------
# Pure-JAX reference (same synthetic backbone) for a tolerance check
# ----------------------------------------------------------------------------
def _reference_forward(img_nchw, params, *, embed_dim, prefix_tokens):
    B, Cin, H, W = img_nchw.shape
    w_conv = params["w_conv"]
    CS = w_conv.shape[1]
    xp = jnp.pad(img_nchw.astype(jnp.float32), ((0, 0), (0, 0), (1, 1), (1, 1)))
    acc = jnp.zeros((B, H, W, CS), jnp.float32)
    for c in range(Cin):
        for ky in range(3):
            for kx in range(3):
                t = (c * 3 + ky) * 3 + kx
                acc = acc + xp[:, c, ky:ky + H, kx:kx + W, None] * w_conv[t]
    act = jnp.maximum(acc + params["b_conv"][0], 0.0) * NF_RELU_GAMMA
    pooled = act.mean(axis=(1, 2))                                     # (B, CS)
    logits = pooled @ params["w_fc"].astype(jnp.float32) + params["b_fc"]
    out = logits @ params["w_ffn"] + params["b_ffn"]
    return out.reshape(-1, prefix_tokens, embed_dim)


if __name__ == "__main__":
    EMBED_DIM = 32
    PREFIX_TOKENS = 8
    B, C, H, W = 2, 1, 16, 16   # in_chans=1 as in the module

    key = jax.random.PRNGKey(0)
    k_img, k_params = jax.random.split(key)
    img = jax.random.normal(k_img, (B, C, H, W), jnp.float32)
    params = init_params(k_params, in_chans=C, stem_ch=STEM_CH,
                         embed_dim=EMBED_DIM, prefix_tokens=PREFIX_TOKENS)

    out = image_encoder_forward(img, params,
                                embed_dim=EMBED_DIM, prefix_tokens=PREFIX_TOKENS)
    out = jax.block_until_ready(out)
    assert out.shape == (B, PREFIX_TOKENS, EMBED_DIM), out.shape

    ref = _reference_forward(img, params,
                             embed_dim=EMBED_DIM, prefix_tokens=PREFIX_TOKENS)
    err = float(jnp.max(jnp.abs(out - ref)))
    assert err < 2e-2, f"max abs error vs reference: {err}"

    print("KERNEL_OK")
</pallas_src>

<mosaic_0001>
module attributes {stable_mosaic.version = 11 : i64} {
  func.func @_encoder_kernel(%arg0: i32, %arg1: memref<8x256x16xf32, #tpu.memory_space<vmem>>, %arg2: memref<16x128xf32, #tpu.memory_space<vmem>>, %arg3: memref<1x128xf32, #tpu.memory_space<vmem>>, %arg4: memref<128x1024xbf16, #tpu.memory_space<vmem>>, %arg5: memref<1x1024xf32, #tpu.memory_space<vmem>>, %arg6: memref<1024x256xf32, #tpu.memory_space<vmem>>, %arg7: memref<1x256xf32, #tpu.memory_space<vmem>>, %arg8: memref<8x256xf32, #tpu.memory_space<vmem>>, %arg9: memref<8x128xf32, #tpu.memory_space<vmem>>) attributes {dimension_semantics = [#tpu.dimension_semantics<parallel>], iteration_bounds = array<i64: 1>, scalar_prefetch = 0 : i64, scratch_operands = 1 : i64, tpu.core_type = #tpu.core_type<tc>, window_params = [{transform_indices = @transform_0, window_bounds = array<i64: 8, 256, 16>}, {pipeline_mode = #tpu.pipeline_mode<synchronous>, transform_indices = @transform_1, window_bounds = array<i64: 16, 128>}, {pipeline_mode = #tpu.pipeline_mode<synchronous>, transform_indices = @transform_2, window_bounds = array<i64: 1, 128>}, {pipeline_mode = #tpu.pipeline_mode<synchronous>, transform_indices = @transform_3, window_bounds = array<i64: 128, 1024>}, {pipeline_mode = #tpu.pipeline_mode<synchronous>, transform_indices = @transform_4, window_bounds = array<i64: 1, 1024>}, {pipeline_mode = #tpu.pipeline_mode<synchronous>, transform_indices = @transform_5, window_bounds = array<i64: 1024, 256>}, {pipeline_mode = #tpu.pipeline_mode<synchronous>, transform_indices = @transform_6, window_bounds = array<i64: 1, 256>}, {transform_indices = @transform_7, window_bounds = array<i64: 8, 256>}]} {
    %c0 = arith.constant 0 : index
    %c0_0 = arith.constant 0 : index
    %0 = vector.load %arg2[%c0, %c0_0] : memref<16x128xf32, #tpu.memory_space<vmem>>, vector<16x128xf32>
    %c0_1 = arith.constant 0 : index
    %c0_2 = arith.constant 0 : index
    %1 = vector.load %arg3[%c0_1, %c0_2] : memref<1x128xf32, #tpu.memory_space<vmem>>, vector<1x128xf32>
    %c0_i32 = arith.constant 0 : i32
    %c8_i32 = arith.constant 8 : i32
    %2 = arith.addi %c0_i32, %c8_i32 : i32
    %c1_i32 = arith.constant 1 : i32
    scf.for %arg10 = %c0_i32 to %2 step %c1_i32  : i32 {
      %16 = arith.index_cast %arg10 : i32 to index
      %c0_17 = arith.constant 0 : index
      %c0_18 = arith.constant 0 : index
      %17 = vector.load %arg1[%16, %c0_17, %c0_18] : memref<8x256x16xf32, #tpu.memory_space<vmem>>, vector<1x256x16xf32>
      %18 = vector.shape_cast %17 : vector<1x256x16xf32> to vector<256x16xf32>
      %cst_19 = arith.constant dense<0.000000e+00> : vector<256x128xf32>
      %19 = tpu.matmul %18, %0, %cst_19 {dimension_numbers = #tpu.dot_dimension_numbers<[1], [0], [0], [1], [0, 0, 1, 1], [], []>} : vector<256x16xf32>, vector<16x128xf32>, vector<256x128xf32> -> vector<256x128xf32>
      %20 = vector.broadcast %1 : vector<1x128xf32> to vector<256x128xf32>
      %21 = arith.addf %19, %20 : vector<256x128xf32>
      %cst_20 = arith.constant 0.000000e+00 : f32
      %22 = vector.broadcast %cst_20 : f32 to vector<256x128xf32>
      %23 = arith.maximumf %21, %22 : vector<256x128xf32>
      %cst_21 = arith.constant 1.71285856 : f32
      %24 = vector.broadcast %cst_21 : f32 to vector<256x128xf32>
      %25 = arith.mulf %23, %24 : vector<256x128xf32>
      %cst_22 = arith.constant dense<0.000000e+00> : vector<128xf32>
      %26 = vector.multi_reduction <add>, %25, %cst_22 [0] : vector<256x128xf32> to vector<128xf32>
      %27 = vector.shape_cast %26 : vector<128xf32> to vector<1x128xf32>
      %cst_23 = arith.constant 3.906250e-03 : f32
      %28 = vector.broadcast %cst_23 : f32 to vector<1x128xf32>
      %29 = arith.mulf %27, %28 : vector<1x128xf32>
      %30 = arith.index_cast %arg10 : i32 to index
      %c0_24 = arith.constant 0 : index
      %31 = vector.load %arg9[%30, %c0_24] : memref<8x128xf32, #tpu.memory_space<vmem>>, vector<1x128xf32>
      tpu.vector_store %arg9[%30, %c0_24], %29 {strides = array<i32>} : memref<8x128xf32, #tpu.memory_space<vmem>>, vector<1x128xf32>,
    }
    %c8_i32_3 = arith.constant 8 : i32
    %c0_4 = arith.constant 0 : index
    %c0_5 = arith.constant 0 : index
    %3 = vector.load %arg9[%c0_4, %c0_5] : memref<8x128xf32, #tpu.memory_space<vmem>>, vector<8x128xf32>
    %4 = arith.truncf %3 : vector<8x128xf32> to vector<8x128xbf16>
    %c0_6 = arith.constant 0 : index
    %c0_7 = arith.constant 0 : index
    %5 = vector.load %arg4[%c0_6, %c0_7] : memref<128x1024xbf16, #tpu.memory_space<vmem>>, vector<128x1024xbf16>
    %cst = arith.constant dense<0.000000e+00> : vector<8x1024xf32>
    %6 = tpu.matmul %4, %5, %cst {dimension_numbers = #tpu.dot_dimension_numbers<[1], [0], [0], [1], [0, 0, 1, 1], [], []>} : vector<8x128xbf16>, vector<128x1024xbf16>, vector<8x1024xf32> -> vector<8x1024xf32>
    %c0_8 = arith.constant 0 : index
    %c0_9 = arith.constant 0 : index
    %7 = vector.load %arg5[%c0_8, %c0_9] : memref<1x1024xf32, #tpu.memory_space<vmem>>, vector<1x1024xf32>
    %8 = vector.broadcast %7 : vector<1x1024xf32> to vector<8x1024xf32>
    %9 = arith.addf %6, %8 : vector<8x1024xf32>
    %c0_10 = arith.constant 0 : index
    %c0_11 = arith.constant 0 : index
    %10 = vector.load %arg6[%c0_10, %c0_11] : memref<1024x256xf32, #tpu.memory_space<vmem>>, vector<1024x256xf32>
    %cst_12 = arith.constant dense<0.000000e+00> : vector<8x256xf32>
    %11 = tpu.matmul %9, %10, %cst_12 {dimension_numbers = #tpu.dot_dimension_numbers<[1], [0], [0], [1], [0, 0, 1, 1], [], []>} : vector<8x1024xf32>, vector<1024x256xf32>, vector<8x256xf32> -> vector<8x256xf32>
    %c0_13 = arith.constant 0 : index
    %c0_14 = arith.constant 0 : index
    %12 = vector.load %arg7[%c0_13, %c0_14] : memref<1x256xf32, #tpu.memory_space<vmem>>, vector<1x256xf32>
    %13 = vector.broadcast %12 : vector<1x256xf32> to vector<8x256xf32>
    %14 = arith.addf %11, %13 : vector<8x256xf32>
    %c0_15 = arith.constant 0 : index
    %c0_16 = arith.constant 0 : index
    %15 = vector.load %arg8[%c0_15, %c0_16] : memref<8x256xf32, #tpu.memory_space<vmem>>, vector<8x256xf32>
    tpu.vector_store %arg8[%c0_15, %c0_16], %14 {strides = array<i32>} : memref<8x256xf32, #tpu.memory_space<vmem>>, vector<8x256xf32>,
    return
  }
  func.func @transform_0(%arg0: i32) -> (i32, i32, i32) {
    %c0_i32 = arith.constant 0 : i32
    %c0_i32_0 = arith.constant 0 : i32
    %c0_i32_1 = arith.constant 0 : i32
    return %arg0, %c0_i32, %c0_i32_0 : i32, i32, i32
  }
  func.func @transform_1(%arg0: i32) -> (i32, i32) {
    %c0_i32 = arith.constant 0 : i32
    %c0_i32_0 = arith.constant 0 : i32
    %c0_i32_1 = arith.constant 0 : i32
    return %c0_i32, %c0_i32_0 : i32, i32
  }
  func.func @transform_2(%arg0: i32) -> (i32, i32) {
    %c0_i32 = arith.constant 0 : i32
    %c0_i32_0 = arith.constant 0 : i32
    %c0_i32_1 = arith.constant 0 : i32
    return %c0_i32, %c0_i32_0 : i32, i32
  }
  func.func @transform_3(%arg0: i32) -> (i32, i32) {
    %c0_i32 = arith.constant 0 : i32
    %c0_i32_0 = arith.constant 0 : i32
    %c0_i32_1 = arith.constant 0 : i32
    return %c0_i32, %c0_i32_0 : i32, i32
  }
  func.func @transform_4(%arg0: i32) -> (i32, i32) {
    %c0_i32 = arith.constant 0 : i32
    %c0_i32_0 = arith.constant 0 : i32
    %c0_i32_1 = arith.constant 0 : i32
    return %c0_i32, %c0_i32_0 : i32, i32
  }
  func.func @transform_5(%arg0: i32) -> (i32, i32) {
    %c0_i32 = arith.constant 0 : i32
    %c0_i32_0 = arith.constant 0 : i32
    %c0_i32_1 = arith.constant 0 : i32
    return %c0_i32, %c0_i32_0 : i32, i32
  }
  func.func @transform_6(%arg0: i32) -> (i32, i32) {
    %c0_i32 = arith.constant 0 : i32
    %c0_i32_0 = arith.constant 0 : i32
    %c0_i32_1 = arith.constant 0 : i32
    return %c0_i32, %c0_i32_0 : i32, i32
  }
  func.func @transform_7(%arg0: i32) -> (i32, i32) {
    %c0_i32 = arith.constant 0 : i32
    %c0_i32_0 = arith.constant 0 : i32
    return %arg0, %c0_i32 : i32, i32
  }
}

</mosaic_0001>

<bundles_post_ra>
// kernel: tpu_custom_call.1
= control target key start
LH: loop header
LB: loop body
LE: loop exit
PB: predicated region body
PF: predicated region fallthrough
CT: control target
= control target key end

     0   :  { %12 = vsyncpa [#allocation4], 0  ;;  %s2966_s0 = inlined_call_operand.vmem [shape: f32[8,256,16], index: 0, kind: input, shape index: {}]   ;;  %s2967_s1 = inlined_call_operand.vmem [shape: f32[16,128], index: 1, kind: input, shape index: {}]   ;;  %s2968_s2 = inlined_call_operand.vmem [shape: f32[1,128], index: 2, kind: input, shape index: {}]   ;;  %s2969_s3 = inlined_call_operand.hbm [shape: bf16[128,1024], index: 3, kind: input, shape index: {}]   ;;  %s2970_s4 = inlined_call_operand.vmem [shape: f32[1,1024], index: 4, kind: input, shape index: {}]   ;;  %s2971_s5 = inlined_call_operand.vmem [shape: f32[1024,256], index: 5, kind: input, shape index: {}]   ;;  %s2972_s6 = inlined_call_operand.vmem [shape: f32[1,256], index: 6, kind: input, shape index: {}]   ;;  %s2973_s7 = inlined_call_operand.hbm [shape: f32[8,256], index: 7, kind: output, shape index: {}]  }
   0x1   :  { %13 = vsyncpa [#allocation5], 0  ;;  %s1939_s24 = smov [#allocation3]  }
   0x2   :  { %s25_s25 = sshll.u32 %s1939_s24, 4  ;;  %s26_s25 = int_to_ptr.vmem [resolvable:$true] %s25_s25 }
   0x3   :  { %s1895_s26 = scalar_lea.vmem %s26_s25, 8192  ;;  %p1900_p1 = scmp.lt.s32.totalorder %s26_s25, %s26_s25 }
   0x4   :  { %p1896_p0 = scmp.ne.s32.totalorder %s26_s25, %s1895_s26  ;;  %p1901_p2 = scmp.lt.s32.totalorder %s1895_s26, %s1895_s26 }
   0x6   :  { %p1902_p3 = por %p1901_p2, %p1900_p1 }
   0x8   :  { %p1903_p4 = pnand %p1902_p3, %p1896_p0 }
   0xa   :  { %1906 = shalt.err (!%p1903_p4)
}
   0xb   :  { %s1940_s27 = smov 512   ;;  %s1941_s28 = smov 32  }
   0xc   :  { %31 = dma.hbm_to_vmem [thread:$0]  %s2969_s3, 8192, %s26_s25, [#allocation4], %s1940_s27, %s1940_s27, %s1941_s28  }
   0xd   :  { %1931 = dma.done.wait [#allocation4], 8192  }
   0xe   :  { %1932 = vsyncadd [#allocation4], 4294959104  ;;  %v1990_v0 = vld [vmem:[%s2967_s1] sm:$0xff]  ;;  %v1995_v1 = vld [vmem:[%s2967_s1 + $0x8] sm:$0xff]  ;;  %s2002_s14 = smov 0  }
   0xf   :  { %v2000_v2 = vld [vmem:[%s2968_s2] ss:$0 sm:$0xff] }
  0x10 LB: > { %1818 = vmatprep.subr.mxu0 %v1995_v1  ;;  %1870 = vmatprep.subr.mxu1 %v1995_v1  ;;  %s1686_s1 = sshll.u32 %s1937_s14, 8  ;;  %vm91_vm0 = vcmask 130048   ;;  %s515_s16 = scalar_lea.vmem [#allocation2], %s1937_s14  ;;  %s1937_s14 = sphi %s2002_s14, %s50_s14  }
  0x11   : > { %1819 = vmatpush3.msra.mxu0 %v1995_v1  ;;  %1872 = vmatpush3.msra.mxu1 %v1995_v1  ;;  %s2018_s15 = scalar_lea.vmem %s2966_s0, %s1686_s1  ;;  %s50_s14 = sadd.s32 1, %s1937_s14  }
  0x12   : > { %1820 = vmatprep.subr.mxu0 %v1990_v0  ;;  %1871 = vmatprep.subr.mxu1 %v1990_v0  ;;  %v53_v3 = vld [vmem:[%s2018_s15] sm:$0xff]  ;;  %v54_v4 = vld [vmem:[%s2018_s15 + $0x8] sm:$0xff]  ;;  %v55_v5 = vld [vmem:[%s2018_s15 + $0x10] sm:$0xff]  ;;  %p47_p5 = scmp.ge.s32.totalorder %s50_s14, 8  }
  0x13   : > { %1821 = vmatpush3.msra.mxu0 %v1990_v0  ;;  %1873 = vmatpush3.msra.mxu1 %v1990_v0  ;;  %v56_v6 = vld [vmem:[%s2018_s15 + $0x18] sm:$0xff]  ;;  %v57_v7 = vld [vmem:[%s2018_s15 + $0x20] sm:$0xff]  ;;  %v70_v9 = vld [vmem:[%s2018_s15 + $0x88] sm:$0xff] }
  0x14   : > { %1822 = vmatprep.mubr.msk.f32.mxu0 %vm91_vm0, %v53_v3  ;;  %v69_v8 = vld [vmem:[%s2018_s15 + $0x80] sm:$0xff]  ;;  %v71_v10 = vld [vmem:[%s2018_s15 + $0x90] sm:$0xff]  ;;  %v58_v11 = vld [vmem:[%s2018_s15 + $0x28] sm:$0xff] }
  0x15   : > { %1823 = vmatmul.mubr.msk.f32.vlgmr.msra.gmra.mxu0 %vm91_vm0, %v54_v4  ;;  %1846 = vmatprep.mubr.msk.f32.mxu1 %vm91_vm0, %v69_v8  ;;  %v59_v12 = vld [vmem:[%s2018_s15 + $0x30] sm:$0xff]  ;;  %v72_v13 = vld [vmem:[%s2018_s15 + $0x98] sm:$0xff]  ;;  %v73_v14 = vld [vmem:[%s2018_s15 + $0xa0] sm:$0xff] }
  0x16   : > { %1825 = vmatprep.mubr.msk.f32.mxu0 %vm91_vm0, %v55_v5  ;;  %1847 = vmatmul.mubr.msk.f32.vlgmr.msra.gmra.mxu1 %vm91_vm0, %v70_v9  ;;  %v60_v15 = vld [vmem:[%s2018_s15 + $0x38] sm:$0xff]  ;;  %v61_v16 = vld [vmem:[%s2018_s15 + $0x40] sm:$0xff]  ;;  %v74_v17 = vld [vmem:[%s2018_s15 + $0xa8] sm:$0xff] }
  0x17   : > { %1849 = vmatprep.mubr.msk.f32.mxu1 %vm91_vm0, %v71_v10  ;;  %v75_v18 = vld [vmem:[%s2018_s15 + $0xb0] sm:$0xff]  ;;  %v62_v19 = vld [vmem:[%s2018_s15 + $0x48] sm:$0xff]  ;;  %v76_v21 = vld [vmem:[%s2018_s15 + $0xb8] sm:$0xff] }
  0x18   : > { %v63_v20 = vld [vmem:[%s2018_s15 + $0x50] sm:$0xff]  ;;  %v77_v22 = vld [vmem:[%s2018_s15 + $0xc0] sm:$0xff]  ;;  %v64_v23 = vld [vmem:[%s2018_s15 + $0x58] sm:$0xff] }
  0x19   : > { %1826 = vmatmul.mubr.msk.f32.gmra.mxu0 %vm91_vm0, %v56_v6  ;;  %v65_v24 = vld [vmem:[%s2018_s15 + $0x60] sm:$0xff]  ;;  %v78_v25 = vld [vmem:[%s2018_s15 + $0xc8] sm:$0xff]  ;;  %v79_v26 = vld [vmem:[%s2018_s15 + $0xd0] sm:$0xff] }
  0x1a   : > { %1828 = vmatprep.mubr.msk.f32.mxu0 %vm91_vm0, %v57_v7  ;;  %1850 = vmatmul.mubr.msk.f32.gmra.mxu1 %vm91_vm0, %v72_v13  ;;  %v66_v27 = vld [vmem:[%s2018_s15 + $0x68] sm:$0xff]  ;;  %v67_v28 = vld [vmem:[%s2018_s15 + $0x70] sm:$0xff]  ;;  %v80_v29 = vld [vmem:[%s2018_s15 + $0xd8] sm:$0xff] }
  0x1b   : > { %1852 = vmatprep.mubr.msk.f32.mxu1 %vm91_vm0, %v73_v14  ;;  %v81_v30 = vld [vmem:[%s2018_s15 + $0xe0] sm:$0xff]  ;;  %v68_v31 = vld [vmem:[%s2018_s15 + $0x78] sm:$0xff]  ;;  %v82_v32 = vld [vmem:[%s2018_s15 + $0xe8] sm:$0xff] }
  0x1c   : > { %v83_v33 = vld [vmem:[%s2018_s15 + $0xf0] sm:$0xff]  ;;  %v84_v34 = vld [vmem:[%s2018_s15 + $0xf8] sm:$0xff]  ;;  %v563_v1 = vld [vmem:[#allocation3 + $0x160] sm:$0xff] (%p47_p5) }
  0x1d   : > { %1829 = vmatmul.mubr.msk.f32.gmra.mxu0 %vm91_vm0, %v58_v11 }
  0x1e   : > { %1831 = vmatprep.mubr.msk.f32.mxu0 %vm91_vm0, %v59_v12  ;;  %1853 = vmatmul.mubr.msk.f32.gmra.mxu1 %vm91_vm0, %v74_v17 }
  0x1f   : > { %1855 = vmatprep.mubr.msk.f32.mxu1 %vm91_vm0, %v75_v18 }
  0x21   : > { %1832 = vmatmul.mubr.msk.f32.gmra.mxu0 %vm91_vm0, %v60_v15 }
  0x22   : > { %1834 = vmatprep.mubr.msk.f32.mxu0 %vm91_vm0, %v61_v16  ;;  %1856 = vmatmul.mubr.msk.f32.gmra.mxu1 %vm91_vm0, %v76_v21 }
  0x23   : > { %1858 = vmatprep.mubr.msk.f32.mxu1 %vm91_vm0, %v77_v22 }
  0x25   : > { %1835 = vmatmul.mubr.msk.f32.gmra.mxu0 %vm91_vm0, %v62_v19 }
  0x26   : > { %1837 = vmatprep.mubr.msk.f32.mxu0 %vm91_vm0, %v63_v20  ;;  %1859 = vmatmul.mubr.msk.f32.gmra.mxu1 %vm91_vm0, %v78_v25 }
  0x27   : > { %1861 = vmatprep.mubr.msk.f32.mxu1 %vm91_vm0, %v79_v26 }
  0x29   : > { %1838 = vmatmul.mubr.msk.f32.gmra.mxu0 %vm91_vm0, %v64_v23 }
  0x2a   : > { %1840 = vmatprep.mubr.msk.f32.mxu0 %vm91_vm0, %v65_v24  ;;  %1862 = vmatmul.mubr.msk.f32.gmra.mxu1 %vm91_vm0, %v80_v29 }
  0x2b   : > { %1864 = vmatprep.mubr.msk.f32.mxu1 %vm91_vm0, %v81_v30 }
  0x2d   : > { %1841 = vmatmul.mubr.msk.f32.gmra.mxu0 %vm91_vm0, %v66_v27 }
  0x2e   : > { %1843 = vmatprep.mubr.msk.f32.mxu0 %vm91_vm0, %v67_v28  ;;  %1865 = vmatmul.mubr.msk.f32.gmra.mxu1 %vm91_vm0, %v82_v32 }
  0x2f   : > { %1867 = vmatprep.mubr.msk.f32.mxu1 %vm91_vm0, %v83_v33 }
  0x31   : > { %1844 = vmatmul.mubr.msk.f32.gmra.mxu0 %vm91_vm0, %v68_v31 }
  0x32   : > { %1868 = vmatmul.mubr.msk.f32.gmra.mxu1 %vm91_vm0, %v84_v34 }
  0xd5   : > { %v1824_v35 = vpop.f32.mrf.mxu0 }
  0xd6   : > { %v260_v36 = vadd.f32 %v1824_v35, %v2000_v2  ;;  %v2088_v43 = vpop.f32.mrf.mxu1 }
  0xd7   : > { %v254_v37 = vpop.f32.mrf.mxu0 }
  0xd8   : > { %v255_v38 = vadd.f32 %v2000_v2, %v254_v37  ;;  %v414_v40 = vmax.f32 %v260_v36, 0.0  ;;  %v2091_v47 = vpop.f32.mrf.mxu1 }
  0xd9   : > { %v1827_v39 = vpop.f32.mrf.mxu0 }
  0xda   : > { %v413_v41 = vmax.f32 %v255_v38, 0.0  ;;  %v270_v42 = vadd.f32 %v1827_v39, %v2000_v2  ;;  %v446_v50 = vmul.f32 1.7128586, %v414_v40  ;;  %v2094_v53 = vpop.f32.mrf.mxu1 }
  0xdb   : > { %v264_v44 = vpop.f32.mrf.mxu0 }
  0xdc   : > { %v445_v45 = vmul.f32 1.7128586, %v413_v41  ;;  %v265_v46 = vadd.f32 %v2000_v2, %v264_v44  ;;  %v416_v48 = vmax.f32 %v270_v42, 0.0  ;;  %v2097_v58 = vpop.f32.mrf.mxu1 }
  0xdd   : > { %v1830_v49 = vpop.f32.mrf.mxu0 }
  0xde   : > { %v415_v51 = vmax.f32 %v265_v46, 0.0  ;;  %v280_v52 = vadd.f32 %v1830_v49, %v2000_v2  ;;  %v477_v55 = vadd.f32 %v446_v50, %v445_v45  ;;  %v448_v59 = vmul.f32 1.7128586, %v416_v48  ;;  %v2100_v4 = vpop.f32.mrf.mxu1 }
  0xdf   : > { %v274_v54 = vpop.f32.mrf.mxu0 }
  0xe0   : > { %v447_v56 = vmul.f32 1.7128586, %v415_v51  ;;  %v275_v57 = vadd.f32 %v2000_v2, %v274_v54  ;;  %v418_v62 = vmax.f32 %v280_v52, 0.0  ;;  %v354_v11 = vpop.f32.mrf.mxu1 }
  0xe1   : > { %v1833_v60 = vpop.f32.mrf.mxu0 }
  0xe2   : > { %v478_v61 = vadd.f32 %v477_v55, %v447_v56  ;;  %v417_v63 = vmax.f32 %v275_v57, 0.0  ;;  %v290_v3 = vadd.f32 %v1833_v60, %v2000_v2  ;;  %v450_v12 = vmul.f32 1.7128586, %v418_v62  ;;  %v2105_v22 = vpop.f32.mrf.mxu1 }
  0xe3   : > { %v284_v5 = vpop.f32.mrf.mxu0  ;;  %v335_v56 = vadd.f32 %v2000_v2, %v2091_v47  ;;  %v340_v57 = vadd.f32 %v2088_v43, %v2000_v2  ;;  %v350_v47 = vadd.f32 %v2094_v53, %v2000_v2 }
  0xe4   : > { %v449_v6 = vmul.f32 1.7128586, %v417_v63  ;;  %v479_v7 = vadd.f32 %v478_v61, %v448_v59  ;;  %v285_v8 = vadd.f32 %v2000_v2, %v284_v5  ;;  %v420_v9 = vmax.f32 %v290_v3, 0.0  ;;  %v364_v33 = vpop.f32.mrf.mxu1 }
  0xe5   : > { %v1836_v10 = vpop.f32.mrf.mxu0 }
  0xe6   : > { %v480_v13 = vadd.f32 %v479_v7, %v449_v6  ;;  %v419_v14 = vmax.f32 %v285_v8, 0.0  ;;  %v300_v15 = vadd.f32 %v1836_v10, %v2000_v2  ;;  %v452_v20 = vmul.f32 1.7128586, %v420_v9  ;;  %v1860_v45 = vpop.f32.mrf.mxu1 }
  0xe7   : > { %v294_v16 = vpop.f32.mrf.mxu0  ;;  %v429_v6 = vmax.f32 %v335_v56, 0.0  ;;  %v345_v7 = vadd.f32 %v2000_v2, %v2097_v58 }
  0xe8   : > { %v451_v17 = vmul.f32 1.7128586, %v419_v14  ;;  %v481_v18 = vadd.f32 %v480_v13, %v450_v12  ;;  %v295_v19 = vadd.f32 %v2000_v2, %v294_v16  ;;  %v422_v24 = vmax.f32 %v300_v15, 0.0  ;;  %v374_v59 = vpop.f32.mrf.mxu1 }
  0xe9   : > { %v1839_v21 = vpop.f32.mrf.mxu0  ;;  %v430_v12 = vmax.f32 %v340_v57, 0.0  ;;  %v461_v43 = vmul.f32 1.7128586, %v429_v6  ;;  %v431_v14 = vmax.f32 %v345_v7, 0.0  ;;  %v355_v15 = vadd.f32 %v2000_v2, %v354_v11 }
  0xea   : > { %v482_v23 = vadd.f32 %v481_v18, %v451_v17  ;;  %v421_v25 = vmax.f32 %v295_v19, 0.0  ;;  %v310_v26 = vadd.f32 %v1839_v21, %v2000_v2  ;;  %v454_v34 = vmul.f32 1.7128586, %v422_v24  ;;  %v1863_v8 = vpop.f32.mrf.mxu1 }
  0xeb   : > { %v304_v27 = vpop.f32.mrf.mxu0  ;;  %v462_v17 = vmul.f32 1.7128586, %v430_v12  ;;  %v432_v19 = vmax.f32 %v350_v47, 0.0  ;;  %v463_v58 = vmul.f32 1.7128586, %v431_v14  ;;  %v365_v24 = vadd.f32 %v2000_v2, %v364_v33 }
  0xec   : > { %v453_v28 = vmul.f32 1.7128586, %v421_v25  ;;  %v483_v29 = vadd.f32 %v482_v23, %v452_v20  ;;  %v305_v30 = vadd.f32 %v2000_v2, %v304_v27  ;;  %v424_v31 = vmax.f32 %v310_v26, 0.0  ;;  %v384_v16 = vpop.f32.mrf.mxu1 }
  0xed   : > { %v1842_v32 = vpop.f32.mrf.mxu0  ;;  %v360_v20 = vadd.f32 %v2100_v4, %v2000_v2  ;;  %v433_v23 = vmax.f32 %v355_v15, 0.0  ;;  %v464_v26 = vmul.f32 1.7128586, %v432_v19 }
  0xee   : > { %v484_v35 = vadd.f32 %v483_v29, %v453_v28  ;;  %v423_v36 = vmax.f32 %v305_v30, 0.0  ;;  %v320_v37 = vadd.f32 %v1842_v32, %v2000_v2  ;;  %v456_v42 = vmul.f32 1.7128586, %v424_v31  ;;  %v1866_v25 = vpop.f32.mrf.mxu1 }
  0xef   : > { %v314_v38 = vpop.f32.mrf.mxu0  ;;  %v434_v27 = vmax.f32 %v360_v20, 0.0  ;;  %v370_v28 = vadd.f32 %v2105_v22, %v2000_v2  ;;  %v465_v11 = vmul.f32 1.7128586, %v433_v23  ;;  %v435_v30 = vmax.f32 %v365_v24, 0.0  ;;  %v579_v23 = vld [vmem:[#allocation3 + $0x1e0] sm:$0xff] (%p47_p5)  ;;  %v576_v24 = vld [vmem:[#allocation3 + $0x1c8] sm:$0xff] (%p47_p5) }
  0xf0   : > { %v455_v39 = vmul.f32 1.7128586, %v423_v36  ;;  %v485_v40 = vadd.f32 %v484_v35, %v454_v34  ;;  %v315_v41 = vadd.f32 %v2000_v2, %v314_v38  ;;  %v426_v48 = vmax.f32 %v320_v37, 0.0  ;;  %v394_v32 = vpop.f32.mrf.mxu1 }
  0xf1   : > { %v1845_v44 = vpop.f32.mrf.mxu0  ;;  %v375_v31 = vadd.f32 %v2000_v2, %v374_v59  ;;  %v466_v34 = vmul.f32 1.7128586, %v434_v27  ;;  %v436_v35 = vmax.f32 %v370_v28, 0.0  ;;  %v380_v36 = vadd.f32 %v1860_v45, %v2000_v2  ;;  %v567_v27 = vld [vmem:[#allocation3 + $0x180] sm:$0xff] (%p47_p5) }
  0xf2   : > { %v486_v46 = vadd.f32 %v485_v40, %v455_v39  ;;  %v425_v49 = vmax.f32 %v315_v41, 0.0  ;;  %v330_v50 = vadd.f32 %v1845_v44, %v2000_v2  ;;  %v458_v60 = vmul.f32 1.7128586, %v426_v48  ;;  %v1869_v40 = vpop.f32.mrf.mxu1  ;;  %v571_v28 = vld [vmem:[#allocation3 + $0x1a0] sm:$0xff] (%p47_p5) }
  0xf3   : > { %v324_v51 = vpop.f32.mrf.mxu0  ;;  %v467_v37 = vmul.f32 1.7128586, %v435_v30  ;;  %v437_v38 = vmax.f32 %v375_v31, 0.0  ;;  %v385_v39 = vadd.f32 %v2000_v2, %v384_v16  ;;  %v468_v41 = vmul.f32 1.7128586, %v436_v35  ;;  %v564_v35 = vld [vmem:[#allocation3 + $0x168] sm:$0xff] (%p47_p5) }
  0xf4   : > { %v457_v52 = vmul.f32 1.7128586, %v425_v49  ;;  %v487_v54 = vadd.f32 %v486_v46, %v456_v42  ;;  %v325_v55 = vadd.f32 %v2000_v2, %v324_v51  ;;  %v428_v62 = vmax.f32 %v330_v50, 0.0  ;;  %v404_v51 = vpop.f32.mrf.mxu1 }
  0xf5   : > { %v438_v22 = vmax.f32 %v380_v36, 0.0  ;;  %v390_v44 = vadd.f32 %v1863_v8, %v2000_v2  ;;  %v469_v46 = vmul.f32 1.7128586, %v437_v38  ;;  %v439_v49 = vmax.f32 %v385_v39, 0.0  ;;  %v551_v39 = vld [vmem:[#allocation3 + $0x100] sm:$0xff] (%p47_p5) }
  0xf6   : > { %v488_v61 = vadd.f32 %v487_v54, %v457_v52  ;;  %v427_v63 = vmax.f32 %v325_v55, 0.0  ;;  %v460_v9 = vmul.f32 1.7128586, %v428_v62  ;;  %v395_v50 = vadd.f32 %v2000_v2, %v394_v32  ;;  %v568_v32 = vld [vmem:[#allocation3 + $0x188] sm:$0xff] (%p47_p5) }
  0xf7   : > { %v470_v52 = vmul.f32 1.7128586, %v438_v22  ;;  %v440_v45 = vmax.f32 %v390_v44, 0.0  ;;  %v400_v55 = vadd.f32 %v1866_v25, %v2000_v2  ;;  %v471_v56 = vmul.f32 1.7128586, %v439_v49  ;;  %v543_v49 = vld [vmem:[#allocation3 + $0xc0] sm:$0xff] (%p47_p5) }
  0xf8   : > { %v459_v3 = vmul.f32 1.7128586, %v427_v63  ;;  %v489_v5 = vadd.f32 %v488_v61, %v458_v60  ;;  %v441_v59 = vmax.f32 %v395_v50, 0.0  ;;  %v405_v60 = vadd.f32 %v2000_v2, %v404_v51  ;;  %v547_v50 = vld [vmem:[#allocation3 + $0xe0] sm:$0xff] (%p47_p5)  ;;  %v544_v51 = vld [vmem:[#allocation3 + $0xc8] sm:$0xff] (%p47_p5) }
  0xf9   : > { %v472_v61 = vmul.f32 1.7128586, %v440_v45  ;;  %v442_v63 = vmax.f32 %v400_v55, 0.0  ;;  %v1769_v31 = vcombine.high (%p47_p5), %v567_v27, %v571_v28  ;;  %v1768_v36 = vcombine.low (%p47_p5), %v567_v27, %v571_v28 }
  0xfa   : > { %v490_v10 = vadd.f32 %v489_v5, %v459_v3  ;;  %v410_v3 = vadd.f32 %v1869_v40, %v2000_v2  ;;  %v473_v5 = vmul.f32 1.7128586, %v441_v59  ;;  %v443_v7 = vmax.f32 %v405_v60, 0.0  ;;  %v560_v2 = vld [vmem:[#allocation3 + $0x148] sm:$0xff] (%p47_p5)  ;;  %v555_v40 = vld [vmem:[#allocation3 + $0x120] sm:$0xff] (%p47_p5) }
  0xfb   : > { %v474_v8 = vmul.f32 1.7128586, %v442_v63  ;;  %v1763_v38 = vcombine.high (%p47_p5), %v560_v2, %v564_v35  ;;  %v1762_v44 = vcombine.low (%p47_p5), %v560_v2, %v564_v35  ;;  %v1745_v55 = vcombine.high (%p47_p5), %v543_v49, %v547_v50  ;;  %v539_v59 = vld [vmem:[#allocation3 + $0xa0] sm:$0xff] (%p47_p5)  ;;  %v536_v60 = vld [vmem:[#allocation3 + $0x88] sm:$0xff] (%p47_p5)  ;;  %v561_v35 = vld [vmem:[#allocation3 + $0x150] sm:$0xff] (%p47_p5) }
  0xfc   : > { %v491_v13 = vadd.f32 %v490_v10, %v460_v9  ;;  %v444_v10 = vmax.f32 %v410_v3, 0.0  ;;  %v475_v12 = vmul.f32 1.7128586, %v443_v7  ;;  %v531_v7 = vld [vmem:[#allocation3 + $0x60] sm:$0xff] (%p47_p5) }
  0xfe   : > { %v492_v18 = vadd.f32 %v491_v13, %v461_v43  ;;  %v476_v13 = vmul.f32 1.7128586, %v444_v10 }
 0x100   : > { %v493_v21 = vadd.f32 %v492_v18, %v462_v17 }
 0x102   : > { %v494_v53 = vadd.f32 %v493_v21, %v463_v58  ;;  %v575_v21 = vld [vmem:[#allocation3 + $0x1c0] sm:$0xff] (%p47_p5) }
 0x103   :  { %v1777_v25 = vcombine.high (%p47_p5), %v575_v21, %v579_v23 }
 0x104   : > { %v495_v29 = vadd.f32 %v494_v53, %v464_v26  ;;  %v580_v26 = vld [vmem:[#allocation3 + $0x1e8] sm:$0xff] (%p47_p5)  ;;  %v1776_v53 = vcombine.low (%p47_p5), %v575_v21, %v579_v23  ;;  %v581_v21 = vld [vmem:[#allocation3 + $0x1f0] sm:$0xff] (%p47_p5)  ;;  %v578_v23 = vld [vmem:[#allocation3 + $0x1d8] sm:$0xff] (%p47_p5) }
 0x105   :  { %v1778_v30 = vcombine.low (%p47_p5), %v576_v24, %v580_v26  ;;  %945 = vmatprep.subr.bf16.mxu0 (%p47_p5), %v1777_v25 }
 0x106   : > { %v496_v4 = vadd.f32 %v495_v29, %v465_v11  ;;  %v1942_v11 = vmov (%p47_p5), 0   ;;  %v1779_v29 = vcombine.high (%p47_p5), %v576_v24, %v580_v26  ;;  %946 = vmatpush1.bf16.msra.mxu0 (%p47_p5), %v1776_v53  ;;  %v582_v24 = vld [vmem:[#allocation3 + $0x1f8] sm:$0xff] (%p47_p5) }
 0x107   :  { %977 = vmatprep.mubr.bf16.mxu0 (%p47_p5), %v1942_v11  ;;  %1018 = vmatprep.mubr.bf16.mxu1 (%p47_p5), %v1942_v11  ;;  %v1783_v28 = vcombine.high (%p47_p5), %v578_v23, %v582_v24 }
 0x108   : > { %v497_v33 = vadd.f32 %v496_v4, %v466_v34  ;;  %v572_v34 = vld [vmem:[#allocation3 + $0x1a8] sm:$0xff] (%p47_p5)  ;;  %v559_v4 = vld [vmem:[#allocation3 + $0x140] sm:$0xff] (%p47_p5)  ;;  %986 = vmatprep.subr.bf16.mxu1 (%p47_p5), %v1779_v29  ;;  %947 = vmatprep.subr.bf16.mxu0 (%p47_p5), %v1769_v31  ;;  %v569_v29 = vld [vmem:[#allocation3 + $0x190] sm:$0xff] (%p47_p5) }
 0x109   :  { %v1771_v0 = vcombine.high (%p47_p5), %v568_v32, %v572_v34  ;;  %987 = vmatpush1.bf16.msra.mxu1 (%p47_p5), %v1778_v30  ;;  %v1760_v22 = vcombine.low (%p47_p5), %v559_v4, %v563_v1  ;;  %v573_v30 = vld [vmem:[#allocation3 + $0x1b0] sm:$0xff] (%p47_p5) }
 0x10a   : > { %v498_v42 = vadd.f32 %v497_v33, %v467_v37  ;;  %v1770_v37 = vcombine.low (%p47_p5), %v568_v32, %v572_v34  ;;  %v1761_v33 = vcombine.high (%p47_p5), %v559_v4, %v563_v1  ;;  %948 = vmatpush1.bf16.msra.mxu0 (%p47_p5), %v1768_v36  ;;  %v570_v32 = vld [vmem:[#allocation3 + $0x198] sm:$0xff] (%p47_p5)  ;;  %v1773_v1 = vcombine.high (%p47_p5), %v569_v29, %v573_v30  ;;  %v565_v36 = vld [vmem:[#allocation3 + $0x170] sm:$0xff] (%p47_p5) }
 0x10b   :  { %988 = vmatprep.subr.bf16.mxu1 (%p47_p5), %v1771_v0  ;;  %v574_v34 = vld [vmem:[#allocation3 + $0x1b8] sm:$0xff] (%p47_p5)  ;;  %v1782_v0 = vcombine.low (%p47_p5), %v578_v23, %v582_v24 }
 0x10c   : > { %v499_v48 = vadd.f32 %v498_v42, %v468_v41  ;;  %v552_v41 = vld [vmem:[#allocation3 + $0x108] sm:$0xff] (%p47_p5)  ;;  %949 = vmatprep.subr.bf16.mxu0 (%p47_p5), %v1761_v33  ;;  %v1775_v2 = vcombine.high (%p47_p5), %v570_v32, %v574_v34  ;;  %v566_v33 = vld [vmem:[#allocation3 + $0x178] sm:$0xff] (%p47_p5) }
 0x10d   :  { %v556_v42 = vld [vmem:[#allocation3 + $0x128] sm:$0xff] (%p47_p5)  ;;  %989 = vmatpush1.bf16.msra.mxu1 (%p47_p5), %v1770_v37  ;;  %v562_v37 = vld [vmem:[#allocation3 + $0x158] sm:$0xff] (%p47_p5) }
 0x10e   : > { %v500_v54 = vadd.f32 %v499_v48, %v469_v46  ;;  %v1753_v46 = vcombine.high (%p47_p5), %v551_v39, %v555_v40  ;;  %990 = vmatprep.subr.bf16.mxu1 (%p47_p5), %v1763_v38  ;;  %v1755_v48 = vcombine.high (%p47_p5), %v552_v41, %v556_v42  ;;  %950 = vmatpush1.bf16.msra.mxu0 (%p47_p5), %v1760_v22  ;;  %v557_v22 = vld [vmem:[#allocation3 + $0x130] sm:$0xff] (%p47_p5) }
 0x10f   :  { %v1754_v45 = vcombine.low (%p47_p5), %v552_v41, %v556_v42  ;;  %v1772_v38 = vcombine.low (%p47_p5), %v569_v29, %v573_v30  ;;  %v1767_v41 = vcombine.high (%p47_p5), %v562_v37, %v566_v33  ;;  %v553_v42 = vld [vmem:[#allocation3 + $0x110] sm:$0xff] (%p47_p5)  ;;  %v1202_v29 = vld [vmem:[%s2971_s5 + $0x2e8] sm:$0xff] (%p47_p5)  ;;  %v1137_v30 = vld [vmem:[%s2971_s5 + $0xe0] sm:$0xff] (%p47_p5) }
 0x110   : > { %v501_v57 = vadd.f32 %v500_v54, %v470_v52  ;;  %v548_v52 = vld [vmem:[#allocation3 + $0xe8] sm:$0xff] (%p47_p5)  ;;  %v1752_v54 = vcombine.low (%p47_p5), %v551_v39, %v555_v40  ;;  %951 = vmatprep.subr.bf16.mxu0 (%p47_p5), %v1753_v46  ;;  %v1774_v39 = vcombine.low (%p47_p5), %v570_v32, %v574_v34  ;;  %v1765_v40 = vcombine.high (%p47_p5), %v561_v35, %v565_v36  ;;  %v558_v46 = vld [vmem:[#allocation3 + $0x138] sm:$0xff] (%p47_p5)  ;;  %v1136_v34 = vld [vmem:[%s2971_s5 + $0xd8] sm:$0xff] (%p47_p5) }
 0x111   :  { %991 = vmatpush1.bf16.msra.mxu1 (%p47_p5), %v1762_v44  ;;  %v1746_v63 = vcombine.low (%p47_p5), %v544_v51, %v548_v52  ;;  %v554_v44 = vld [vmem:[#allocation3 + $0x118] sm:$0xff] (%p47_p5) }
 0x112   : > { %v502_v62 = vadd.f32 %v501_v57, %v471_v56  ;;  %992 = vmatprep.subr.bf16.mxu1 (%p47_p5), %v1755_v48  ;;  %v1747_v56 = vcombine.high (%p47_p5), %v544_v51, %v548_v52  ;;  %v535_v57 = vld [vmem:[#allocation3 + $0x80] sm:$0xff] (%p47_p5)  ;;  %952 = vmatpush1.bf16.msra.mxu0 (%p47_p5), %v1752_v54  ;;  %v1764_v48 = vcombine.low (%p47_p5), %v561_v35, %v565_v36  ;;  %v545_v52 = vld [vmem:[#allocation3 + $0xd0] sm:$0xff] (%p47_p5)  ;;  %v1201_v32 = vld [vmem:[%s2971_s5 + $0x2e0] sm:$0xff] (%p47_p5) }
 0x113   :  { %953 = vmatprep.subr.bf16.mxu0 (%p47_p5), %v1745_v55  ;;  %v1737_v3 = vcombine.high (%p47_p5), %v535_v57, %v539_v59  ;;  %v1736_v10 = vcombine.low (%p47_p5), %v535_v57, %v539_v59  ;;  %v1759_v51 = vcombine.high (%p47_p5), %v554_v44, %v558_v46  ;;  %v549_v54 = vld [vmem:[#allocation3 + $0xf0] sm:$0xff] (%p47_p5)  ;;  %v550_v55 = vld [vmem:[#allocation3 + $0xf8] sm:$0xff] (%p47_p5)  ;;  %v1758_v57 = vcombine.low (%p47_p5), %v554_v44, %v558_v46 }
 0x114   : > { %v503_v6 = vadd.f32 %v502_v62, %v472_v61  ;;  %v540_v61 = vld [vmem:[#allocation3 + $0xa8] sm:$0xff] (%p47_p5)  ;;  %v1744_v62 = vcombine.low (%p47_p5), %v543_v49, %v547_v50  ;;  %v1766_v49 = vcombine.low (%p47_p5), %v562_v37, %v566_v33  ;;  %v1757_v50 = vcombine.high (%p47_p5), %v553_v42, %v557_v22  ;;  %v1133_v35 = vld [vmem:[%s2971_s5 + $0xc0] sm:$0xff] (%p47_p5)  ;;  %v1132_v37 = vld [vmem:[%s2971_s5 + $0xb8] sm:$0xff] (%p47_p5) }
 0x115   :  { %993 = vmatpush1.bf16.msra.mxu1 (%p47_p5), %v1754_v45  ;;  %v546_v45 = vld [vmem:[#allocation3 + $0xd8] sm:$0xff] (%p47_p5)  ;;  %v1749_v59 = vcombine.high (%p47_p5), %v545_v52, %v549_v54  ;;  %v1196_v33 = vld [vmem:[%s2971_s5 + $0x2b8] sm:$0xff] (%p47_p5) }
 0x116   : > { %v504_v9 = vadd.f32 %v503_v6, %v473_v5  ;;  %994 = vmatprep.subr.bf16.mxu1 (%p47_p5), %v1747_v56  ;;  %v1739_v5 = vcombine.high (%p47_p5), %v536_v60, %v540_v61  ;;  %v527_v6 = vld [vmem:[#allocation3 + $0x40] sm:$0xff] (%p47_p5)  ;;  %954 = vmatpush1.bf16.msra.mxu0 (%p47_p5), %v1744_v62  ;;  %v1756_v56 = vcombine.low (%p47_p5), %v553_v42, %v557_v22  ;;  %v538_v62 = vld [vmem:[#allocation3 + $0x98] sm:$0xff] (%p47_p5)  ;;  %v1128_v44 = vld [vmem:[%s2971_s5 + $0x98] sm:$0xff] (%p47_p5) }
 0x117   :  { %955 = vmatprep.subr.bf16.mxu0 (%p47_p5), %v1737_v3  ;;  %v1748_v3 = vcombine.low (%p47_p5), %v545_v52, %v549_v54  ;;  %v1197_v36 = vld [vmem:[%s2971_s5 + $0x2c0] sm:$0xff] (%p47_p5)  ;;  %v1192_v46 = vld [vmem:[%s2971_s5 + $0x298] sm:$0xff] (%p47_p5) }
 0x118   : > { %v505_v47 = vadd.f32 %v504_v9, %v474_v8  ;;  %v528_v8 = vld [vmem:[#allocation3 + $0x48] sm:$0xff] (%p47_p5)  ;;  %v1129_v42 = vld [vmem:[%s2971_s5 + $0xa0] sm:$0xff] (%p47_p5) }
 0x119   :  { %v532_v9 = vld [vmem:[#allocation3 + $0x68] sm:$0xff] (%p47_p5)  ;;  %995 = vmatpush1.bf16.msra.mxu1 (%p47_p5), %v1746_v63  ;;  %v542_v63 = vld [vmem:[#allocation3 + $0xb8] sm:$0xff] (%p47_p5) }
 0x11a   : > { %v506_v43 = vadd.f32 %v505_v47, %v475_v12  ;;  %v1738_v12 = vcombine.low (%p47_p5), %v536_v60, %v540_v61  ;;  %v1729_v47 = vcombine.high (%p47_p5), %v527_v6, %v531_v7  ;;  %996 = vmatprep.subr.bf16.mxu1 (%p47_p5), %v1739_v5  ;;  %956 = vmatpush1.bf16.msra.mxu0 (%p47_p5), %v1736_v10  ;;  %v537_v60 = vld [vmem:[#allocation3 + $0x90] sm:$0xff] (%p47_p5)  ;;  %v530_v10 = vld [vmem:[#allocation3 + $0x58] sm:$0xff] (%p47_p5) }
 0x11b   :  { %v541_v61 = vld [vmem:[#allocation3 + $0xb0] sm:$0xff] (%p47_p5)  ;;  %v1750_v5 = vcombine.low (%p47_p5), %v546_v45, %v550_v55  ;;  %v1193_v22 = vld [vmem:[%s2971_s5 + $0x2a0] sm:$0xff] (%p47_p5) }
 0x11c   : > { %v507_v14 = vadd.f32 %v506_v43, %v476_v13  ;;  %v1731_v13 = vcombine.high (%p47_p5), %v528_v8, %v532_v9  ;;  %v519_v43 = vld [vmem:[#allocation3] sm:$0xff] (%p47_p5)  ;;  %957 = vmatprep.subr.bf16.mxu0 (%p47_p5), %v1729_v47  ;;  %v1740_v47 = vcombine.low (%p47_p5), %v537_v60, %v541_v61  ;;  %v1125_v52 = vld [vmem:[%s2971_s5 + $0x80] sm:$0xff] (%p47_p5) }
 0x11d   :  { %997 = vmatpush1.bf16.msra.mxu1 (%p47_p5), %v1738_v12  ;;  %v534_v12 = vld [vmem:[#allocation3 + $0x78] sm:$0xff] (%p47_p5) }
 0x11e   : > { %v508_v15 = vrot.slane %v507_v14, 4  ;;  %998 = vmatprep.subr.bf16.mxu1 (%p47_p5), %v1731_v13  ;;  %v1742_v13 = vcombine.low (%p47_p5), %v538_v62, %v542_v63  ;;  %v1189_v54 = vld [vmem:[%s2971_s5 + $0x280] sm:$0xff] (%p47_p5) }
 0x120   : > { %v509_v16 = vadd.f32 %v508_v15, %v507_v14  ;;  %v523_v14 = vld [vmem:[#allocation3 + $0x20] sm:$0xff] (%p47_p5)  ;;  %v520_v15 = vld [vmem:[#allocation3 + $0x8] sm:$0xff] (%p47_p5) }
 0x121   :  { %v1720_v25 = vcombine.low (%p47_p5), %v519_v43, %v523_v14 }
 0x122   : > { %v510_v17 = vrot.slane %v509_v16, 2 }
 0x124   : > { %v511_v18 = vadd.f32 %v510_v17, %v509_v16  ;;  %v524_v16 = vld [vmem:[#allocation3 + $0x28] sm:$0xff] (%p47_p5)  ;;  %v1728_v17 = vcombine.low (%p47_p5), %v527_v6, %v531_v7  ;;  %v1741_v6 = vcombine.high (%p47_p5), %v537_v60, %v541_v61  ;;  %v1743_v7 = vcombine.high (%p47_p5), %v538_v62, %v542_v63  ;;  %v1121_v60 = vld [vmem:[%s2971_s5 + $0x60] sm:$0xff] (%p47_p5)  ;;  %v1120_v62 = vld [vmem:[%s2971_s5 + $0x58] sm:$0xff] (%p47_p5) }
 0x125   :  { %v1722_v53 = vcombine.low (%p47_p5), %v520_v15, %v524_v16  ;;  %v1185_v61 = vld [vmem:[%s2971_s5 + $0x260] sm:$0xff] (%p47_p5)  ;;  %v1184_v63 = vld [vmem:[%s2971_s5 + $0x258] sm:$0xff] (%p47_p5) }
 0x126   : > { %v512_v19 = vrot.slane %v511_v18, 1  ;;  %958 = vmatpush1.bf16.msra.mxu0 (%p47_p5), %v1728_v17  ;;  %v522_v17 = vld [vmem:[#allocation3 + $0x18] sm:$0xff] (%p47_p5) }
 0x128   : > { %v513_v20 = vadd.f32 %v512_v19, %v511_v18  ;;  %49 = sbr.rel (!%p47_p5) target bundleno = 16 (0x10), region = 61  ;;  %v1730_v18 = vcombine.low (%p47_p5), %v528_v8, %v532_v9  ;;  %v1721_v19 = vcombine.high (%p47_p5), %v519_v43, %v523_v14  ;;  %v529_v8 = vld [vmem:[#allocation3 + $0x50] sm:$0xff] (%p47_p5)  ;;  %v1735_v14 = vcombine.high (%p47_p5), %v530_v10, %v534_v12 }
 0x129   :  { %v533_v9 = vld [vmem:[#allocation3 + $0x70] sm:$0xff] (%p47_p5) }
 0x12a   : > { %v514_v58 = vmul.f32 0.00390625, %v513_v20  ;;  %v1723_v20 = vcombine.high (%p47_p5), %v520_v15, %v524_v16  ;;  %999 = vmatpush1.bf16.msra.mxu1 (%p47_p5), %v1730_v18  ;;  %959 = vmatprep.subr.bf16.mxu0 (%p47_p5), %v1721_v19  ;;  %v1733_v43 = vcombine.high (%p47_p5), %v529_v8, %v533_v9  ;;  %v521_v15 = vld [vmem:[#allocation3 + $0x10] sm:$0xff] (%p47_p5)  ;;  %v526_v18 = vld [vmem:[#allocation3 + $0x38] sm:$0xff] (%p47_p5)  ;;  %v1732_v19 = vcombine.low (%p47_p5), %v529_v8, %v533_v9 }
 0x12b   :  { %960 = vmatpush1.bf16.msra.mxu0 (%p47_p5), %v1720_v25  ;;  %v525_v16 = vld [vmem:[#allocation3 + $0x30] sm:$0xff] (%p47_p5)  ;;  %v1726_v24 = vcombine.low (%p47_p5), %v522_v17, %v526_v18  ;;  %v1117_v8 = vld [vmem:[%s2971_s5 + $0x40] sm:$0xff] (%p47_p5) }
 0x12c   : > { %516 = vst [vmem:[%s515_s16] sm:$0x1] %v514_v58  ;;  %v577_v58 = vld [vmem:[#allocation3 + $0x1d0] sm:$0xff] (%p47_p5)  ;;  %1000 = vmatprep.subr.bf16.mxu1 (%p47_p5), %v1723_v20  ;;  %v1734_v20 = vcombine.low (%p47_p5), %v530_v10, %v534_v12  ;;  %v1724_v23 = vcombine.low (%p47_p5), %v521_v15, %v525_v16  ;;  %v1181_v9 = vld [vmem:[%s2971_s5 + $0x240] sm:$0xff] (%p47_p5) }
 0x12d   :  { %v1781_v27 = vcombine.high %v577_v58, %v581_v21  ;;  %v1780_v4 = vcombine.low %v577_v58, %v581_v21  ;;  %v1725_v58 = vcombine.high %v521_v15, %v525_v16  ;;  %v1727_v21 = vcombine.high %v522_v17, %v526_v18  ;;  %v1140_v25 = vld [vmem:[%s2971_s5 + $0xf8] sm:$0xff]  ;;  %v1113_v15 = vld [vmem:[%s2971_s5 + $0x20] sm:$0xff] }
 0x12e   :  { %1001 = vmatpush1.bf16.msra.mxu1 %v1722_v53  ;;  %v1139_v53 = vld [vmem:[%s2971_s5 + $0xf0] sm:$0xff]  ;;  %v1116_v10 = vld [vmem:[%s2971_s5 + $0x38] sm:$0xff]  ;;  %v1177_v16 = vld [vmem:[%s2971_s5 + $0x220] sm:$0xff] }
 0x12f   :  { %1027 = vmatprep.subr.bf16.mxu0 %v1781_v27  ;;  %1068 = vmatprep.subr.bf16.mxu1 %v1783_v28  ;;  %v1203_v27 = vld [vmem:[%s2971_s5 + $0x2f0] sm:$0xff]  ;;  %v1138_v28 = vld [vmem:[%s2971_s5 + $0xe8] sm:$0xff]  ;;  %v1180_v12 = vld [vmem:[%s2971_s5 + $0x238] sm:$0xff] }
 0x130   :  { %v1112_v17 = vld [vmem:[%s2971_s5 + $0x18] sm:$0xff] }
 0x131   :  { %v1176_v18 = vld [vmem:[%s2971_s5 + $0x218] sm:$0xff] }
 0x133   :  { %v517_v26 = vld [vmem:[#allocation2] sm:$0xff] }
 0x134   :  { %v2141_v31 = vpack.c.bf16 %v517_v26, %v517_v26  ;;  %v1204_v26 = vld [vmem:[%s2971_s5 + $0x2f8] sm:$0xff] }
 0x136   :  { %978 = vmatmul.mubr.bf16.vlgmr.msra.gmra.mxu0 %v2141_v31  ;;  %1019 = vmatmul.mubr.bf16.vlgmr.msra.gmra.mxu1 %v2141_v31 }
 0x137   :  { %1028 = vmatpush1.bf16.msra.mxu0 %v1780_v4  ;;  %1069 = vmatpush1.bf16.msra.mxu1 %v1782_v0  ;;  %v1200_v4 = vld [vmem:[%s2971_s5 + $0x2d8] sm:$0xff]  ;;  %v1135_v0 = vld [vmem:[%s2971_s5 + $0xd0] sm:$0xff] }
 0x138   :  { %1029 = vmatprep.subr.bf16.mxu0 %v1773_v1  ;;  %1070 = vmatprep.subr.bf16.mxu1 %v1775_v2  ;;  %v1134_v1 = vld [vmem:[%s2971_s5 + $0xc8] sm:$0xff] }
 0x139   :  { %1059 = vmatprep.mubr.bf16.mxu0 %v1942_v11  ;;  %1100 = vmatprep.mubr.bf16.mxu1 %v1942_v11  ;;  %v1751_v11 = vcombine.high %v546_v45, %v550_v55  ;;  %v1198_v2 = vld [vmem:[%s2971_s5 + $0x2c8] sm:$0xff]  ;;  %v1124_v45 = vld [vmem:[%s2971_s5 + $0x78] sm:$0xff] }
 0x13a   :  { %v1188_v55 = vld [vmem:[%s2971_s5 + $0x278] sm:$0xff] }
 0x13b   :  { %1030 = vmatpush1.bf16.msra.mxu0 %v1772_v38  ;;  %1071 = vmatpush1.bf16.msra.mxu1 %v1774_v39  ;;  %v1131_v38 = vld [vmem:[%s2971_s5 + $0xb0] sm:$0xff] }
 0x13c   :  { %1031 = vmatprep.subr.bf16.mxu0 %v1765_v40  ;;  %1072 = vmatprep.subr.bf16.mxu1 %v1767_v41  ;;  %v1195_v39 = vld [vmem:[%s2971_s5 + $0x2b0] sm:$0xff]  ;;  %v1130_v40 = vld [vmem:[%s2971_s5 + $0xa8] sm:$0xff] }
 0x13d   :  { %v1194_v41 = vld [vmem:[%s2971_s5 + $0x2a8] sm:$0xff] }
 0x13f   :  { %1032 = vmatpush1.bf16.msra.mxu0 %v1764_v48  ;;  %1073 = vmatpush1.bf16.msra.mxu1 %v1766_v49  ;;  %v1127_v48 = vld [vmem:[%s2971_s5 + $0x90] sm:$0xff] }
 0x140   :  { %1033 = vmatprep.subr.bf16.mxu0 %v1757_v50  ;;  %1074 = vmatprep.subr.bf16.mxu1 %v1759_v51  ;;  %v1191_v49 = vld [vmem:[%s2971_s5 + $0x290] sm:$0xff]  ;;  %v1126_v50 = vld [vmem:[%s2971_s5 + $0x88] sm:$0xff] }
 0x141   :  { %v1190_v51 = vld [vmem:[%s2971_s5 + $0x288] sm:$0xff] }
 0x143   :  { %1034 = vmatpush1.bf16.msra.mxu0 %v1756_v56  ;;  %1075 = vmatpush1.bf16.msra.mxu1 %v1758_v57  ;;  %v1123_v56 = vld [vmem:[%s2971_s5 + $0x70] sm:$0xff] }
 0x144   :  { %1035 = vmatprep.subr.bf16.mxu0 %v1749_v59  ;;  %1076 = vmatprep.subr.bf16.mxu1 %v1751_v11  ;;  %v1187_v57 = vld [vmem:[%s2971_s5 + $0x270] sm:$0xff]  ;;  %v1122_v59 = vld [vmem:[%s2971_s5 + $0x68] sm:$0xff] }
 0x145   :  { %v1186_v11 = vld [vmem:[%s2971_s5 + $0x268] sm:$0xff] }
 0x147   :  { %1036 = vmatpush1.bf16.msra.mxu0 %v1748_v3  ;;  %1077 = vmatpush1.bf16.msra.mxu1 %v1750_v5  ;;  %v1119_v3 = vld [vmem:[%s2971_s5 + $0x50] sm:$0xff] }
 0x148   :  { %1037 = vmatprep.subr.bf16.mxu0 %v1741_v6  ;;  %1078 = vmatprep.subr.bf16.mxu1 %v1743_v7  ;;  %v1183_v5 = vld [vmem:[%s2971_s5 + $0x250] sm:$0xff]  ;;  %v1118_v6 = vld [vmem:[%s2971_s5 + $0x48] sm:$0xff] }
 0x149   :  { %v1182_v7 = vld [vmem:[%s2971_s5 + $0x248] sm:$0xff] }
 0x14b   :  { %1038 = vmatpush1.bf16.msra.mxu0 %v1740_v47  ;;  %1079 = vmatpush1.bf16.msra.mxu1 %v1742_v13  ;;  %v1115_v47 = vld [vmem:[%s2971_s5 + $0x30] sm:$0xff] }
 0x14c   :  { %1039 = vmatprep.subr.bf16.mxu0 %v1733_v43  ;;  %1080 = vmatprep.subr.bf16.mxu1 %v1735_v14  ;;  %v1179_v13 = vld [vmem:[%s2971_s5 + $0x230] sm:$0xff]  ;;  %v1114_v43 = vld [vmem:[%s2971_s5 + $0x28] sm:$0xff] }
 0x14d   :  { %v1178_v14 = vld [vmem:[%s2971_s5 + $0x228] sm:$0xff] }
 0x14f   :  { %1040 = vmatpush1.bf16.msra.mxu0 %v1732_v19  ;;  %1081 = vmatpush1.bf16.msra.mxu1 %v1734_v20  ;;  %v1111_v19 = vld [vmem:[%s2971_s5 + $0x10] sm:$0xff] }
 0x150   :  { %1041 = vmatprep.subr.bf16.mxu0 %v1725_v58  ;;  %1082 = vmatprep.subr.bf16.mxu1 %v1727_v21  ;;  %v1175_v20 = vld [vmem:[%s2971_s5 + $0x210] sm:$0xff]  ;;  %v1110_v58 = vld [vmem:[%s2971_s5 + $0x8] sm:$0xff] }
 0x151   :  { %v1174_v21 = vld [vmem:[%s2971_s5 + $0x208] sm:$0xff] }
 0x153   :  { %1042 = vmatpush1.bf16.msra.mxu0 %v1724_v23  ;;  %1083 = vmatpush1.bf16.msra.mxu1 %v1726_v24  ;;  %v1109_v23 = vld [vmem:[%s2971_s5] sm:$0xff] }
 0x154   :  { %1377 = vmatprep.subr.mxu0 %v1140_v25  ;;  %1448 = vmatprep.subr.mxu1 %v1204_v26  ;;  %v1173_v24 = vld [vmem:[%s2971_s5 + $0x200] sm:$0xff]  ;;  %v1172_v25 = vld [vmem:[%s2971_s5 + $0x1f8] sm:$0xff] }
 0x155   :  { %v1236_v26 = vld [vmem:[%s2971_s5 + $0x3f8] sm:$0xff] }
 0x156   :  { %1060 = vmatmul.mubr.bf16.vlgmr.msra.gmra.mxu0 %v2141_v31  ;;  %1101 = vmatmul.mubr.bf16.vlgmr.msra.gmra.mxu1 %v2141_v31  ;;  %v1199_v31 = vld [vmem:[%s2971_s5 + $0x2d0] sm:$0xff] }
 0x157   :  { %1378 = vmatpush1.msra.mxu0 %v1139_v53  ;;  %1449 = vmatpush1.msra.mxu1 %v1203_v27  ;;  %v1171_v53 = vld [vmem:[%s2971_s5 + $0x1f0] sm:$0xff] }
 0x158   :  { %1379 = vmatprep.subr.mxu0 %v1138_v28  ;;  %1450 = vmatprep.subr.mxu1 %v1202_v29  ;;  %v1235_v27 = vld [vmem:[%s2971_s5 + $0x3f0] sm:$0xff]  ;;  %v1170_v28 = vld [vmem:[%s2971_s5 + $0x1e8] sm:$0xff] }
 0x159   :  { %1380 = vmatpush1.msra.mxu0 %v1137_v30  ;;  %1451 = vmatpush1.msra.mxu1 %v1201_v32  ;;  %v1234_v29 = vld [vmem:[%s2971_s5 + $0x3e8] sm:$0xff]  ;;  %v1169_v30 = vld [vmem:[%s2971_s5 + $0x1e0] sm:$0xff] }
 0x15a   :  { %1381 = vmatprep.subr.mxu0 %v1136_v34  ;;  %1452 = vmatprep.subr.mxu1 %v1200_v4  ;;  %v1233_v32 = vld [vmem:[%s2971_s5 + $0x3e0] sm:$0xff]  ;;  %v1168_v34 = vld [vmem:[%s2971_s5 + $0x1d8] sm:$0xff] }
 0x15b   :  { %1382 = vmatpush1.msra.mxu0 %v1135_v0  ;;  %1453 = vmatpush1.msra.mxu1 %v1199_v31  ;;  %v1232_v4 = vld [vmem:[%s2971_s5 + $0x3d8] sm:$0xff]  ;;  %v1167_v0 = vld [vmem:[%s2971_s5 + $0x1d0] sm:$0xff] }
 0x15c   :  { %1383 = vmatprep.subr.mxu0 %v1134_v1  ;;  %1454 = vmatprep.subr.mxu1 %v1198_v2  ;;  %v1231_v31 = vld [vmem:[%s2971_s5 + $0x3d0] sm:$0xff]  ;;  %v1166_v1 = vld [vmem:[%s2971_s5 + $0x1c8] sm:$0xff] }
 0x15d   :  { %1384 = vmatpush1.msra.mxu0 %v1133_v35  ;;  %1455 = vmatpush1.msra.mxu1 %v1197_v36  ;;  %v1230_v2 = vld [vmem:[%s2971_s5 + $0x3c8] sm:$0xff]  ;;  %v1165_v35 = vld [vmem:[%s2971_s5 + $0x1c0] sm:$0xff] }
 0x15e   :  { %1385 = vmatprep.subr.mxu0 %v1132_v37  ;;  %1456 = vmatprep.subr.mxu1 %v1196_v33  ;;  %v1229_v36 = vld [vmem:[%s2971_s5 + $0x3c0] sm:$0xff]  ;;  %v1164_v37 = vld [vmem:[%s2971_s5 + $0x1b8] sm:$0xff] }
 0x15f   :  { %1386 = vmatpush1.msra.mxu0 %v1131_v38  ;;  %1457 = vmatpush1.msra.mxu1 %v1195_v39  ;;  %v1228_v33 = vld [vmem:[%s2971_s5 + $0x3b8] sm:$0xff]  ;;  %v1163_v38 = vld [vmem:[%s2971_s5 + $0x1b0] sm:$0xff] }
 0x160   :  { %1387 = vmatprep.subr.mxu0 %v1130_v40  ;;  %1458 = vmatprep.subr.mxu1 %v1194_v41  ;;  %v1227_v39 = vld [vmem:[%s2971_s5 + $0x3b0] sm:$0xff]  ;;  %v1162_v40 = vld [vmem:[%s2971_s5 + $0x1a8] sm:$0xff] }
 0x161   :  { %1388 = vmatpush1.msra.mxu0 %v1129_v42  ;;  %1459 = vmatpush1.msra.mxu1 %v1193_v22  ;;  %v1226_v41 = vld [vmem:[%s2971_s5 + $0x3a8] sm:$0xff]  ;;  %v1161_v42 = vld [vmem:[%s2971_s5 + $0x1a0] sm:$0xff] }
 0x162   :  { %1389 = vmatprep.subr.mxu0 %v1128_v44  ;;  %1460 = vmatprep.subr.mxu1 %v1192_v46  ;;  %v1225_v22 = vld [vmem:[%s2971_s5 + $0x3a0] sm:$0xff]  ;;  %v1160_v44 = vld [vmem:[%s2971_s5 + $0x198] sm:$0xff] }
 0x163   :  { %1390 = vmatpush1.msra.mxu0 %v1127_v48  ;;  %1461 = vmatpush1.msra.mxu1 %v1191_v49  ;;  %v1224_v46 = vld [vmem:[%s2971_s5 + $0x398] sm:$0xff]  ;;  %v1159_v48 = vld [vmem:[%s2971_s5 + $0x190] sm:$0xff] }
 0x164   :  { %1391 = vmatprep.subr.mxu0 %v1126_v50  ;;  %1462 = vmatprep.subr.mxu1 %v1190_v51  ;;  %v1223_v49 = vld [vmem:[%s2971_s5 + $0x390] sm:$0xff]  ;;  %v1158_v50 = vld [vmem:[%s2971_s5 + $0x188] sm:$0xff] }
 0x165   :  { %1392 = vmatpush1.msra.mxu0 %v1125_v52  ;;  %1463 = vmatpush1.msra.mxu1 %v1189_v54  ;;  %v1222_v51 = vld [vmem:[%s2971_s5 + $0x388] sm:$0xff]  ;;  %v1157_v52 = vld [vmem:[%s2971_s5 + $0x180] sm:$0xff] }
 0x166   :  { %1393 = vmatprep.subr.mxu0 %v1124_v45  ;;  %1464 = vmatprep.subr.mxu1 %v1188_v55  ;;  %v1221_v54 = vld [vmem:[%s2971_s5 + $0x380] sm:$0xff]  ;;  %v1156_v45 = vld [vmem:[%s2971_s5 + $0x178] sm:$0xff] }
 0x167   :  { %1394 = vmatpush1.msra.mxu0 %v1123_v56  ;;  %1465 = vmatpush1.msra.mxu1 %v1187_v57  ;;  %v1220_v55 = vld [vmem:[%s2971_s5 + $0x378] sm:$0xff]  ;;  %v1155_v56 = vld [vmem:[%s2971_s5 + $0x170] sm:$0xff] }
 0x168   :  { %1395 = vmatprep.subr.mxu0 %v1122_v59  ;;  %1466 = vmatprep.subr.mxu1 %v1186_v11  ;;  %v1219_v57 = vld [vmem:[%s2971_s5 + $0x370] sm:$0xff]  ;;  %v1154_v59 = vld [vmem:[%s2971_s5 + $0x168] sm:$0xff] }
 0x169   :  { %1396 = vmatpush1.msra.mxu0 %v1121_v60  ;;  %1467 = vmatpush1.msra.mxu1 %v1185_v61  ;;  %v1218_v11 = vld [vmem:[%s2971_s5 + $0x368] sm:$0xff]  ;;  %v1153_v60 = vld [vmem:[%s2971_s5 + $0x160] sm:$0xff] }
 0x16a   :  { %1397 = vmatprep.subr.mxu0 %v1120_v62  ;;  %1468 = vmatprep.subr.mxu1 %v1184_v63  ;;  %v1217_v61 = vld [vmem:[%s2971_s5 + $0x360] sm:$0xff]  ;;  %v1152_v62 = vld [vmem:[%s2971_s5 + $0x158] sm:$0xff] }
 0x16b   :  { %1398 = vmatpush1.msra.mxu0 %v1119_v3  ;;  %1469 = vmatpush1.msra.mxu1 %v1183_v5  ;;  %v1216_v63 = vld [vmem:[%s2971_s5 + $0x358] sm:$0xff]  ;;  %v1151_v3 = vld [vmem:[%s2971_s5 + $0x150] sm:$0xff] }
 0x16c   :  { %1399 = vmatprep.subr.mxu0 %v1118_v6  ;;  %1470 = vmatprep.subr.mxu1 %v1182_v7  ;;  %v1215_v5 = vld [vmem:[%s2971_s5 + $0x350] sm:$0xff]  ;;  %v1150_v6 = vld [vmem:[%s2971_s5 + $0x148] sm:$0xff] }
 0x16d   :  { %1400 = vmatpush1.msra.mxu0 %v1117_v8  ;;  %1471 = vmatpush1.msra.mxu1 %v1181_v9  ;;  %v1214_v7 = vld [vmem:[%s2971_s5 + $0x348] sm:$0xff]  ;;  %v1149_v8 = vld [vmem:[%s2971_s5 + $0x140] sm:$0xff] }
 0x16e   :  { %1401 = vmatprep.subr.mxu0 %v1116_v10  ;;  %1472 = vmatprep.subr.mxu1 %v1180_v12  ;;  %v1213_v9 = vld [vmem:[%s2971_s5 + $0x340] sm:$0xff]  ;;  %v1148_v10 = vld [vmem:[%s2971_s5 + $0x138] sm:$0xff] }
 0x16f   :  { %1402 = vmatpush1.msra.mxu0 %v1115_v47  ;;  %1473 = vmatpush1.msra.mxu1 %v1179_v13  ;;  %v1212_v12 = vld [vmem:[%s2971_s5 + $0x338] sm:$0xff]  ;;  %v1147_v47 = vld [vmem:[%s2971_s5 + $0x130] sm:$0xff] }
 0x170   :  { %1403 = vmatprep.subr.mxu0 %v1114_v43  ;;  %1474 = vmatprep.subr.mxu1 %v1178_v14  ;;  %v1211_v13 = vld [vmem:[%s2971_s5 + $0x330] sm:$0xff]  ;;  %v1146_v43 = vld [vmem:[%s2971_s5 + $0x128] sm:$0xff] }
 0x171   :  { %1404 = vmatpush1.msra.mxu0 %v1113_v15  ;;  %1475 = vmatpush1.msra.mxu1 %v1177_v16  ;;  %v1210_v14 = vld [vmem:[%s2971_s5 + $0x328] sm:$0xff]  ;;  %v1145_v15 = vld [vmem:[%s2971_s5 + $0x120] sm:$0xff] }
 0x172   :  { %1405 = vmatprep.subr.mxu0 %v1112_v17  ;;  %1476 = vmatprep.subr.mxu1 %v1176_v18  ;;  %v1209_v16 = vld [vmem:[%s2971_s5 + $0x320] sm:$0xff]  ;;  %v1144_v17 = vld [vmem:[%s2971_s5 + $0x118] sm:$0xff] }
 0x173   :  { %1406 = vmatpush1.msra.mxu0 %v1111_v19  ;;  %1477 = vmatpush1.msra.mxu1 %v1175_v20  ;;  %v1208_v18 = vld [vmem:[%s2971_s5 + $0x318] sm:$0xff]  ;;  %v1143_v19 = vld [vmem:[%s2971_s5 + $0x110] sm:$0xff] }
 0x174   :  { %1407 = vmatprep.subr.mxu0 %v1110_v58  ;;  %1478 = vmatprep.subr.mxu1 %v1174_v21  ;;  %v1207_v20 = vld [vmem:[%s2971_s5 + $0x310] sm:$0xff]  ;;  %v1142_v58 = vld [vmem:[%s2971_s5 + $0x108] sm:$0xff] }
 0x175   :  { %1408 = vmatpush1.msra.mxu0 %v1109_v23  ;;  %1479 = vmatpush1.msra.mxu1 %v1173_v24  ;;  %v1206_v21 = vld [vmem:[%s2971_s5 + $0x308] sm:$0xff]  ;;  %v1141_v23 = vld [vmem:[%s2971_s5 + $0x100] sm:$0xff] }
 0x176   :  { %1409 = vmatprep.subr.mxu0 %v1172_v25  ;;  %1480 = vmatprep.subr.mxu1 %v1236_v26  ;;  %v1205_v24 = vld [vmem:[%s2971_s5 + $0x300] sm:$0xff]  ;;  %v1268_v25 = vld [vmem:[%s2971_s5 + $0x4f8] sm:$0xff] }
 0x177   :  { %1410 = vmatpush2.msra.mxu0 %v1171_v53  ;;  %1481 = vmatpush2.msra.mxu1 %v1235_v27  ;;  %v1332_v26 = vld [vmem:[%s2971_s5 + $0x6f8] sm:$0xff]  ;;  %v585_v53 = vlaneseq }
 0x178   :  { %1411 = vmatprep.subr.mxu0 %v1170_v28  ;;  %1482 = vmatprep.subr.mxu1 %v1234_v29 }
 0x179   :  { %1412 = vmatpush2.msra.mxu0 %v1169_v30  ;;  %1483 = vmatpush2.msra.mxu1 %v1233_v32  ;;  %v2539_v27 = vshrl.u32 %v585_v53, 7  ;;  %v1311_v53 = vld [vmem:[%s2971_s5 + $0x650] sm:$0xff] }
 0x17a   :  { %1413 = vmatprep.subr.mxu0 %v1168_v34  ;;  %1484 = vmatprep.subr.mxu1 %v1232_v4  ;;  %v2548_v34 = vld [vmem:[%s2970_s4] sm:$0xff] }
 0x17b   :  { %1414 = vmatpush2.msra.mxu0 %v1167_v0  ;;  %1485 = vmatpush2.msra.mxu1 %v1231_v31  ;;  %v595_v28 = vsub.s32 2, %v2539_v27  ;;  %v591_v29 = vsub.s32 1, %v2539_v27  ;;  %v587_v30 = vsub.s32 0, %v2539_v27  ;;  %v599_v32 = vsub.s32 3, %v2539_v27 }
 0x17c   :  { %1415 = vmatprep.subr.mxu0 %v1166_v1  ;;  %1486 = vmatprep.subr.mxu1 %v1230_v2 }
 0x17d   :  { %1416 = vmatpush2.msra.mxu0 %v1165_v35  ;;  %1487 = vmatpush2.msra.mxu1 %v1229_v36  ;;  %v596_v4 = vrot.slane %v2548_v34, %v595_v28  ;;  %v592_v0 = vrot.slane %v2548_v34, %v591_v29  ;;  %v588_v31 = vrot.slane %v2548_v34, %v587_v30  ;;  %v1246_v28 = vld [vmem:[%s2971_s5 + $0x448] sm:$0xff] }
 0x17e   :  { %1417 = vmatprep.subr.mxu0 %v1164_v37  ;;  %1488 = vmatprep.subr.mxu1 %v1228_v33  ;;  %v600_v2 = vrot.slane %v2548_v34, %v599_v32  ;;  %v1310_v32 = vld [vmem:[%s2971_s5 + $0x648] sm:$0xff] }
 0x17f   :  { %1418 = vmatpush2.msra.mxu0 %v1163_v38  ;;  %1489 = vmatpush2.msra.mxu1 %v1227_v39 }
 0x180   :  { %1419 = vmatprep.subr.mxu0 %v1162_v40  ;;  %1490 = vmatprep.subr.mxu1 %v1226_v41 }
 0x181   :  { %1420 = vmatpush2.msra.mxu0 %v1161_v42  ;;  %1491 = vmatpush2.msra.mxu1 %v1225_v22  ;;  %v1267_v42 = vld [vmem:[%s2971_s5 + $0x4f0] sm:$0xff] }
 0x182   :  { %1421 = vmatprep.subr.mxu0 %v1160_v44  ;;  %1492 = vmatprep.subr.mxu1 %v1224_v46  ;;  %v1331_v44 = vld [vmem:[%s2971_s5 + $0x6f0] sm:$0xff]  ;;  %v1266_v46 = vld [vmem:[%s2971_s5 + $0x4e8] sm:$0xff] }
 0x183   :  { %1422 = vmatpush2.msra.mxu0 %v1159_v48  ;;  %1493 = vmatpush2.msra.mxu1 %v1223_v49  ;;  %v1330_v49 = vld [vmem:[%s2971_s5 + $0x6e8] sm:$0xff] }
 0x184   :  { %1423 = vmatprep.subr.mxu0 %v1158_v50  ;;  %1494 = vmatprep.subr.mxu1 %v1222_v51  ;;  %v1265_v50 = vld [vmem:[%s2971_s5 + $0x4e0] sm:$0xff] }
 0x185   :  { %1424 = vmatpush2.msra.mxu0 %v1157_v52  ;;  %1495 = vmatpush2.msra.mxu1 %v1221_v54  ;;  %v1329_v52 = vld [vmem:[%s2971_s5 + $0x6e0] sm:$0xff]  ;;  %v1264_v54 = vld [vmem:[%s2971_s5 + $0x4d8] sm:$0xff] }
 0x186   :  { %1425 = vmatprep.subr.mxu0 %v1156_v45  ;;  %1496 = vmatprep.subr.mxu1 %v1220_v55  ;;  %v1328_v45 = vld [vmem:[%s2971_s5 + $0x6d8] sm:$0xff]  ;;  %v1263_v55 = vld [vmem:[%s2971_s5 + $0x4d0] sm:$0xff] }
 0x187   :  { %1426 = vmatpush2.msra.mxu0 %v1155_v56  ;;  %1497 = vmatpush2.msra.mxu1 %v1219_v57  ;;  %v1327_v56 = vld [vmem:[%s2971_s5 + $0x6d0] sm:$0xff]  ;;  %v1262_v57 = vld [vmem:[%s2971_s5 + $0x4c8] sm:$0xff] }
 0x188   :  { %1427 = vmatprep.subr.mxu0 %v1154_v59  ;;  %1498 = vmatprep.subr.mxu1 %v1218_v11  ;;  %v1326_v59 = vld [vmem:[%s2971_s5 + $0x6c8] sm:$0xff]  ;;  %v1261_v11 = vld [vmem:[%s2971_s5 + $0x4c0] sm:$0xff] }
 0x189   :  { %1428 = vmatpush2.msra.mxu0 %v1153_v60  ;;  %1499 = vmatpush2.msra.mxu1 %v1217_v61  ;;  %v1325_v60 = vld [vmem:[%s2971_s5 + $0x6c0] sm:$0xff]  ;;  %v1260_v61 = vld [vmem:[%s2971_s5 + $0x4b8] sm:$0xff] }
 0x18a   :  { %1429 = vmatprep.subr.mxu0 %v1152_v62  ;;  %1500 = vmatprep.subr.mxu1 %v1216_v63  ;;  %v1324_v62 = vld [vmem:[%s2971_s5 + $0x6b8] sm:$0xff]  ;;  %v1259_v63 = vld [vmem:[%s2971_s5 + $0x4b0] sm:$0xff] }
 0x18b   :  { %1430 = vmatpush2.msra.mxu0 %v1151_v3  ;;  %1501 = vmatpush2.msra.mxu1 %v1215_v5  ;;  %v1323_v3 = vld [vmem:[%s2971_s5 + $0x6b0] sm:$0xff]  ;;  %v1258_v5 = vld [vmem:[%s2971_s5 + $0x4a8] sm:$0xff] }
 0x18c   :  { %1431 = vmatprep.subr.mxu0 %v1150_v6  ;;  %1502 = vmatprep.subr.mxu1 %v1214_v7  ;;  %v1322_v6 = vld [vmem:[%s2971_s5 + $0x6a8] sm:$0xff]  ;;  %v1257_v7 = vld [vmem:[%s2971_s5 + $0x4a0] sm:$0xff] }
 0x18d   :  { %1432 = vmatpush2.msra.mxu0 %v1149_v8  ;;  %1503 = vmatpush2.msra.mxu1 %v1213_v9  ;;  %v1321_v8 = vld [vmem:[%s2971_s5 + $0x6a0] sm:$0xff]  ;;  %v1256_v9 = vld [vmem:[%s2971_s5 + $0x498] sm:$0xff] }
 0x18e   :  { %1433 = vmatprep.subr.mxu0 %v1148_v10  ;;  %1504 = vmatprep.subr.mxu1 %v1212_v12  ;;  %v1320_v10 = vld [vmem:[%s2971_s5 + $0x698] sm:$0xff]  ;;  %v1255_v12 = vld [vmem:[%s2971_s5 + $0x490] sm:$0xff] }
 0x18f   :  { %1434 = vmatpush2.msra.mxu0 %v1147_v47  ;;  %1505 = vmatpush2.msra.mxu1 %v1211_v13  ;;  %v1319_v47 = vld [vmem:[%s2971_s5 + $0x690] sm:$0xff]  ;;  %v1254_v13 = vld [vmem:[%s2971_s5 + $0x488] sm:$0xff] }
 0x190   :  { %1435 = vmatprep.subr.mxu0 %v1146_v43  ;;  %1506 = vmatprep.subr.mxu1 %v1210_v14  ;;  %v1318_v43 = vld [vmem:[%s2971_s5 + $0x688] sm:$0xff]  ;;  %v1253_v14 = vld [vmem:[%s2971_s5 + $0x480] sm:$0xff] }
 0x191   :  { %1436 = vmatpush2.msra.mxu0 %v1145_v15  ;;  %1507 = vmatpush2.msra.mxu1 %v1209_v16  ;;  %v1317_v15 = vld [vmem:[%s2971_s5 + $0x680] sm:$0xff]  ;;  %v1252_v16 = vld [vmem:[%s2971_s5 + $0x478] sm:$0xff] }
 0x192   :  { %1437 = vmatprep.subr.mxu0 %v1144_v17  ;;  %1508 = vmatprep.subr.mxu1 %v1208_v18  ;;  %v1316_v17 = vld [vmem:[%s2971_s5 + $0x678] sm:$0xff]  ;;  %v1251_v18 = vld [vmem:[%s2971_s5 + $0x470] sm:$0xff] }
 0x193   :  { %1438 = vmatpush2.msra.mxu0 %v1143_v19  ;;  %1509 = vmatpush2.msra.mxu1 %v1207_v20  ;;  %v1315_v19 = vld [vmem:[%s2971_s5 + $0x670] sm:$0xff]  ;;  %v1250_v20 = vld [vmem:[%s2971_s5 + $0x468] sm:$0xff] }
 0x194   :  { %1439 = vmatprep.subr.mxu0 %v1142_v58  ;;  %1510 = vmatprep.subr.mxu1 %v1206_v21  ;;  %v1314_v58 = vld [vmem:[%s2971_s5 + $0x668] sm:$0xff]  ;;  %v1249_v21 = vld [vmem:[%s2971_s5 + $0x460] sm:$0xff] }
 0x195   :  { %1440 = vmatpush2.msra.mxu0 %v1141_v23  ;;  %1511 = vmatpush2.msra.mxu1 %v1205_v24  ;;  %v1313_v23 = vld [vmem:[%s2971_s5 + $0x660] sm:$0xff]  ;;  %v1248_v24 = vld [vmem:[%s2971_s5 + $0x458] sm:$0xff] }
 0x196   :  { %1519 = vmatprep.subr.mxu0 %v1268_v25  ;;  %1590 = vmatprep.subr.mxu1 %v1332_v26  ;;  %v1312_v25 = vld [vmem:[%s2971_s5 + $0x658] sm:$0xff]  ;;  %v1247_v26 = vld [vmem:[%s2971_s5 + $0x450] sm:$0xff] }
 0x1f6   :  { %v979_v1 = vpop.f32.mrf.mxu0  ;;  %v1020_v35 = vpop.f32.mrf.mxu1 }
 0x1f7   :  { %v1021_v37 = vadd.f32 %v1020_v35, %v596_v4  ;;  %v980_v39 = vadd.f32 %v979_v1, %v588_v31  ;;  %v1245_v4 = vld [vmem:[%s2971_s5 + $0x440] sm:$0xff]  ;;  %v1244_v31 = vld [vmem:[%s2971_s5 + $0x438] sm:$0xff]  ;;  %v1307_v35 = vld [vmem:[%s2971_s5 + $0x630] sm:$0xff] }
 0x1f8   :  { %v981_v36 = vpop.f32.mrf.mxu0  ;;  %v1022_v38 = vpop.f32.mrf.mxu1  ;;  %v1308_v1 = vld [vmem:[%s2971_s5 + $0x638] sm:$0xff] }
 0x1f9   :  { %v982_v33 = vadd.f32 %v981_v36, %v592_v0  ;;  %v1023_v40 = vadd.f32 %v1022_v38, %v600_v2  ;;  %v1309_v0 = vld [vmem:[%s2971_s5 + $0x640] sm:$0xff]  ;;  %v1243_v2 = vld [vmem:[%s2971_s5 + $0x430] sm:$0xff]  ;;  %v1242_v36 = vld [vmem:[%s2971_s5 + $0x428] sm:$0xff] }
 0x1fa   :  { %v983_v41 = vpop.f32.mrf.mxu0  ;;  %v1024_v22 = vpop.f32.mrf.mxu1  ;;  %v1305_v38 = vld [vmem:[%s2971_s5 + $0x620] sm:$0xff] }
 0x1fb   :  { %1441 = vmatprep.mubr.f32.mxu0 %v982_v33  ;;  %1512 = vmatprep.mubr.f32.mxu1 %v1023_v40  ;;  %v1241_v33 = vld [vmem:[%s2971_s5 + $0x420] sm:$0xff]  ;;  %v1304_v40 = vld [vmem:[%s2971_s5 + $0x618] sm:$0xff]  ;;  %v1239_v41 = vld [vmem:[%s2971_s5 + $0x410] sm:$0xff] }
 0x1fc   :  { %v984_v48 = vpop.f32.mrf.mxu0  ;;  %1442 = vmatmul.mubr.f32.vlgmr.msra.gmra.mxu0 %v980_v39  ;;  %v1025_v51 = vpop.f32.mrf.mxu1  ;;  %1513 = vmatmul.mubr.f32.vlgmr.msra.gmra.mxu1 %v1021_v37  ;;  %v1306_v37 = vld [vmem:[%s2971_s5 + $0x628] sm:$0xff]  ;;  %v1240_v39 = vld [vmem:[%s2971_s5 + $0x418] sm:$0xff]  ;;  %v1303_v22 = vld [vmem:[%s2971_s5 + $0x610] sm:$0xff] }
 0x1fd   :  { %1520 = vmatpush1.msra.mxu0 %v1267_v42  ;;  %1591 = vmatpush1.msra.mxu1 %v1331_v44  ;;  %v1238_v44 = vld [vmem:[%s2971_s5 + $0x408] sm:$0xff]  ;;  %v1301_v51 = vld [vmem:[%s2971_s5 + $0x600] sm:$0xff] }
 0x1fe   :  { %1521 = vmatprep.subr.mxu0 %v1266_v46  ;;  %1592 = vmatprep.subr.mxu1 %v1330_v49  ;;  %v1302_v48 = vld [vmem:[%s2971_s5 + $0x608] sm:$0xff]  ;;  %v1237_v49 = vld [vmem:[%s2971_s5 + $0x400] sm:$0xff] }
 0x1ff   :  { %1522 = vmatpush1.msra.mxu0 %v1265_v50  ;;  %1593 = vmatpush1.msra.mxu1 %v1329_v52  ;;  %v1300_v52 = vld [vmem:[%s2971_s5 + $0x5f8] sm:$0xff] }
 0x200   :  { %1523 = vmatprep.subr.mxu0 %v1264_v54  ;;  %1594 = vmatprep.subr.mxu1 %v1328_v45  ;;  %v1364_v45 = vld [vmem:[%s2971_s5 + $0x7f8] sm:$0xff] }
 0x201   :  { %1524 = vmatpush1.msra.mxu0 %v1263_v55  ;;  %1595 = vmatpush1.msra.mxu1 %v1327_v56  ;;  %v1299_v55 = vld [vmem:[%s2971_s5 + $0x5f0] sm:$0xff] }
 0x202   :  { %1525 = vmatprep.subr.mxu0 %v1262_v57  ;;  %1596 = vmatprep.subr.mxu1 %v1326_v59  ;;  %v1363_v57 = vld [vmem:[%s2971_s5 + $0x7f0] sm:$0xff]  ;;  %v1298_v59 = vld [vmem:[%s2971_s5 + $0x5e8] sm:$0xff] }
 0x203   :  { %1526 = vmatpush1.msra.mxu0 %v1261_v11  ;;  %1597 = vmatpush1.msra.mxu1 %v1325_v60  ;;  %v1362_v60 = vld [vmem:[%s2971_s5 + $0x7e8] sm:$0xff] }
 0x204   :  { %1527 = vmatprep.subr.mxu0 %v1260_v61  ;;  %1598 = vmatprep.subr.mxu1 %v1324_v62  ;;  %v1297_v61 = vld [vmem:[%s2971_s5 + $0x5e0] sm:$0xff] }
 0x205   :  { %1528 = vmatpush1.msra.mxu0 %v1259_v63  ;;  %1599 = vmatpush1.msra.mxu1 %v1323_v3  ;;  %v1361_v63 = vld [vmem:[%s2971_s5 + $0x7e0] sm:$0xff]  ;;  %v1296_v3 = vld [vmem:[%s2971_s5 + $0x5d8] sm:$0xff] }
 0x206   :  { %1529 = vmatprep.subr.mxu0 %v1258_v5  ;;  %1600 = vmatprep.subr.mxu1 %v1322_v6  ;;  %v1360_v6 = vld [vmem:[%s2971_s5 + $0x7d8] sm:$0xff] }
 0x207   :  { %1530 = vmatpush1.msra.mxu0 %v1257_v7  ;;  %1601 = vmatpush1.msra.mxu1 %v1321_v8  ;;  %v1295_v7 = vld [vmem:[%s2971_s5 + $0x5d0] sm:$0xff] }
 0x208   :  { %1531 = vmatprep.subr.mxu0 %v1256_v9  ;;  %1602 = vmatprep.subr.mxu1 %v1320_v10  ;;  %v1359_v8 = vld [vmem:[%s2971_s5 + $0x7d0] sm:$0xff]  ;;  %v1294_v9 = vld [vmem:[%s2971_s5 + $0x5c8] sm:$0xff] }
 0x209   :  { %1532 = vmatpush1.msra.mxu0 %v1255_v12  ;;  %1603 = vmatpush1.msra.mxu1 %v1319_v47  ;;  %v1358_v10 = vld [vmem:[%s2971_s5 + $0x7c8] sm:$0xff]  ;;  %v1293_v12 = vld [vmem:[%s2971_s5 + $0x5c0] sm:$0xff] }
 0x20a   :  { %1533 = vmatprep.subr.mxu0 %v1254_v13  ;;  %1604 = vmatprep.subr.mxu1 %v1318_v43  ;;  %v1357_v47 = vld [vmem:[%s2971_s5 + $0x7c0] sm:$0xff]  ;;  %v1292_v13 = vld [vmem:[%s2971_s5 + $0x5b8] sm:$0xff] }
 0x20b   :  { %1534 = vmatpush1.msra.mxu0 %v1253_v14  ;;  %1605 = vmatpush1.msra.mxu1 %v1317_v15  ;;  %v1356_v43 = vld [vmem:[%s2971_s5 + $0x7b8] sm:$0xff]  ;;  %v1291_v14 = vld [vmem:[%s2971_s5 + $0x5b0] sm:$0xff] }
 0x20c   :  { %1535 = vmatprep.subr.mxu0 %v1252_v16  ;;  %1606 = vmatprep.subr.mxu1 %v1316_v17  ;;  %v1355_v15 = vld [vmem:[%s2971_s5 + $0x7b0] sm:$0xff]  ;;  %v1290_v16 = vld [vmem:[%s2971_s5 + $0x5a8] sm:$0xff] }
 0x20d   :  { %1536 = vmatpush1.msra.mxu0 %v1251_v18  ;;  %1607 = vmatpush1.msra.mxu1 %v1315_v19  ;;  %v1354_v17 = vld [vmem:[%s2971_s5 + $0x7a8] sm:$0xff]  ;;  %v1289_v18 = vld [vmem:[%s2971_s5 + $0x5a0] sm:$0xff] }
 0x20e   :  { %1537 = vmatprep.subr.mxu0 %v1250_v20  ;;  %1608 = vmatprep.subr.mxu1 %v1314_v58  ;;  %v1353_v19 = vld [vmem:[%s2971_s5 + $0x7a0] sm:$0xff]  ;;  %v1288_v20 = vld [vmem:[%s2971_s5 + $0x598] sm:$0xff] }
 0x20f   :  { %1538 = vmatpush1.msra.mxu0 %v1249_v21  ;;  %1609 = vmatpush1.msra.mxu1 %v1313_v23  ;;  %v1352_v58 = vld [vmem:[%s2971_s5 + $0x798] sm:$0xff]  ;;  %v1287_v21 = vld [vmem:[%s2971_s5 + $0x590] sm:$0xff] }
 0x210   :  { %1539 = vmatprep.subr.mxu0 %v1248_v24  ;;  %1610 = vmatprep.subr.mxu1 %v1312_v25  ;;  %v1351_v23 = vld [vmem:[%s2971_s5 + $0x790] sm:$0xff]  ;;  %v1286_v24 = vld [vmem:[%s2971_s5 + $0x588] sm:$0xff] }
 0x211   :  { %1540 = vmatpush1.msra.mxu0 %v1247_v26  ;;  %1611 = vmatpush1.msra.mxu1 %v1311_v53  ;;  %v1350_v25 = vld [vmem:[%s2971_s5 + $0x788] sm:$0xff]  ;;  %v1285_v26 = vld [vmem:[%s2971_s5 + $0x580] sm:$0xff] }
 0x212   :  { %1541 = vmatprep.subr.mxu0 %v1246_v28  ;;  %1612 = vmatprep.subr.mxu1 %v1310_v32  ;;  %v1349_v53 = vld [vmem:[%s2971_s5 + $0x780] sm:$0xff]  ;;  %v1284_v28 = vld [vmem:[%s2971_s5 + $0x578] sm:$0xff] }
 0x213   :  { %1542 = vmatpush1.msra.mxu0 %v1245_v4  ;;  %1613 = vmatpush1.msra.mxu1 %v1309_v0  ;;  %v1348_v32 = vld [vmem:[%s2971_s5 + $0x778] sm:$0xff]  ;;  %v1283_v4 = vld [vmem:[%s2971_s5 + $0x570] sm:$0xff] }
 0x214   :  { %1543 = vmatprep.subr.mxu0 %v1244_v31  ;;  %1614 = vmatprep.subr.mxu1 %v1308_v1  ;;  %v1347_v0 = vld [vmem:[%s2971_s5 + $0x770] sm:$0xff]  ;;  %v1282_v31 = vld [vmem:[%s2971_s5 + $0x568] sm:$0xff] }
 0x215   :  { %1544 = vmatpush1.msra.mxu0 %v1243_v2  ;;  %1615 = vmatpush1.msra.mxu1 %v1307_v35  ;;  %v1346_v1 = vld [vmem:[%s2971_s5 + $0x768] sm:$0xff]  ;;  %v1281_v2 = vld [vmem:[%s2971_s5 + $0x560] sm:$0xff] }
 0x216   :  { %1545 = vmatprep.subr.mxu0 %v1242_v36  ;;  %v2729_v42 = vpop.f32.mrf.mxu0  ;;  %1616 = vmatprep.subr.mxu1 %v1306_v37  ;;  %v2737_v46 = vpop.f32.mrf.mxu1  ;;  %v1345_v35 = vld [vmem:[%s2971_s5 + $0x760] sm:$0xff]  ;;  %v1280_v36 = vld [vmem:[%s2971_s5 + $0x558] sm:$0xff] }
 0x217   :  { %1546 = vmatpush1.msra.mxu0 %v1241_v33  ;;  %1617 = vmatpush1.msra.mxu1 %v1305_v38  ;;  %v1344_v37 = vld [vmem:[%s2971_s5 + $0x758] sm:$0xff]  ;;  %v1279_v33 = vld [vmem:[%s2971_s5 + $0x550] sm:$0xff]  ;;  %v607_v38 = vsub.s32 5, %v2539_v27 }
 0x218   :  { %1547 = vmatprep.subr.mxu0 %v1240_v39  ;;  %v2745_v50 = vpop.f32.mrf.mxu0  ;;  %1618 = vmatprep.subr.mxu1 %v1304_v40  ;;  %v2753_v54 = vpop.f32.mrf.mxu1  ;;  %v1343_v39 = vld [vmem:[%s2971_s5 + $0x750] sm:$0xff]  ;;  %v1278_v40 = vld [vmem:[%s2971_s5 + $0x548] sm:$0xff] }
 0x219   :  { %1548 = vmatpush1.msra.mxu0 %v1239_v41  ;;  %1619 = vmatpush1.msra.mxu1 %v1303_v22  ;;  %v1342_v41 = vld [vmem:[%s2971_s5 + $0x748] sm:$0xff]  ;;  %v1277_v22 = vld [vmem:[%s2971_s5 + $0x540] sm:$0xff] }
 0x21a   :  { %1549 = vmatprep.subr.mxu0 %v1238_v44  ;;  %v1065_v56 = vpop.f32.mrf.mxu0  ;;  %1620 = vmatprep.subr.mxu1 %v1302_v48  ;;  %v1106_v11 = vpop.f32.mrf.mxu1  ;;  %v1341_v44 = vld [vmem:[%s2971_s5 + $0x740] sm:$0xff]  ;;  %v615_v48 = vsub.s32 7, %v2539_v27 }
 0x21b   :  { %1550 = vmatpush1.msra.mxu0 %v1237_v49  ;;  %1621 = vmatpush1.msra.mxu1 %v1301_v51  ;;  %v1276_v49 = vld [vmem:[%s2971_s5 + $0x538] sm:$0xff]  ;;  %v608_v51 = vrot.slane %v2548_v34, %v607_v38  ;;  %v603_v56 = vsub.s32 4, %v2539_v27  ;;  %v1338_v11 = vld [vmem:[%s2971_s5 + $0x728] sm:$0xff] }
 0x21c   :  { %1551 = vmatprep.subr.mxu0 %v1300_v52  ;;  %v1066_v62 = vpop.f32.mrf.mxu0  ;;  %1622 = vmatprep.subr.mxu1 %v1364_v45  ;;  %v1107_v5 = vpop.f32.mrf.mxu1  ;;  %v611_v52 = vsub.s32 6, %v2539_v27  ;;  %v1340_v45 = vld [vmem:[%s2971_s5 + $0x738] sm:$0xff] }
 0x21d   :  { %1552 = vmatpush2.msra.mxu0 %v1299_v55  ;;  %1623 = vmatpush2.msra.mxu1 %v1363_v57  ;;  %v1275_v55 = vld [vmem:[%s2971_s5 + $0x530] sm:$0xff]  ;;  %v1337_v62 = vld [vmem:[%s2971_s5 + $0x720] sm:$0xff] }
 0x21e   :  { %1553 = vmatprep.subr.mxu0 %v1298_v59  ;;  %1624 = vmatprep.subr.mxu1 %v1362_v60  ;;  %v1339_v57 = vld [vmem:[%s2971_s5 + $0x730] sm:$0xff]  ;;  %v1274_v59 = vld [vmem:[%s2971_s5 + $0x528] sm:$0xff]  ;;  %v1273_v60 = vld [vmem:[%s2971_s5 + $0x520] sm:$0xff]  ;;  %v612_v5 = vrot.slane %v2548_v34, %v611_v52 }
 0x21f   :  { %1554 = vmatpush2.msra.mxu0 %v1297_v61  ;;  %1625 = vmatpush2.msra.mxu1 %v1361_v63  ;;  %v616_v61 = vrot.slane %v2548_v34, %v615_v48  ;;  %v1272_v63 = vld [vmem:[%s2971_s5 + $0x518] sm:$0xff] }
 0x220   :  { %1555 = vmatprep.subr.mxu0 %v1296_v3  ;;  %1626 = vmatprep.subr.mxu1 %v1360_v6  ;;  %v1064_v3 = vadd.f32 %v2745_v50, %v608_v51  ;;  %v1336_v6 = vld [vmem:[%s2971_s5 + $0x718] sm:$0xff]  ;;  %v1335_v50 = vld [vmem:[%s2971_s5 + $0x710] sm:$0xff] }
 0x221   :  { %1556 = vmatpush2.msra.mxu0 %v1295_v7  ;;  %1627 = vmatpush2.msra.mxu1 %v1359_v8  ;;  %v1271_v7 = vld [vmem:[%s2971_s5 + $0x510] sm:$0xff]  ;;  %v604_v8 = vrot.slane %v2548_v34, %v603_v56  ;;  %v1269_v34 = vld [vmem:[%s2971_s5 + $0x500] sm:$0xff] }
 0x222   :  { %1557 = vmatprep.subr.mxu0 %v1294_v9  ;;  %1628 = vmatprep.subr.mxu1 %v1358_v10  ;;  %v1270_v9 = vld [vmem:[%s2971_s5 + $0x508] sm:$0xff] }
 0x223   :  { %1558 = vmatpush2.msra.mxu0 %v1293_v12  ;;  %1629 = vmatpush2.msra.mxu1 %v1357_v47  ;;  %v1334_v10 = vld [vmem:[%s2971_s5 + $0x708] sm:$0xff]  ;;  %v1105_v12 = vadd.f32 %v2753_v54, %v616_v61  ;;  %v1333_v47 = vld [vmem:[%s2971_s5 + $0x700] sm:$0xff]  ;;  %s1943_s5 = smov [#allocation6]  }
 0x224   :  { %1559 = vmatprep.subr.mxu0 %v1292_v13  ;;  %1630 = vmatprep.subr.mxu1 %v1356_v43  ;;  %v1103_v13 = vadd.f32 %v2737_v46, %v612_v5  ;;  %v1062_v43 = vadd.f32 %v2729_v42, %v604_v8  ;;  %v1365_v54 = vld [vmem:[%s2972_s6] sm:$0x3]  ;;  %s1669_s6 = sshll.u32 %s1943_s5, 4  ;;  %s1670_s6 = int_to_ptr.vmem [resolvable:$true] %s1669_s6 }
 0x225   :  { %1560 = vmatpush2.msra.mxu0 %v1291_v14  ;;  %1631 = vmatpush2.msra.mxu1 %v1355_v15  ;;  %v1370_v15 = vrot.slane %v1365_v54, %v587_v30  ;;  %v1374_v46 = vrot.slane %v1365_v54, %v591_v29  ;;  %s1907_s13 = scalar_lea.vmem %s1670_s6, 256  ;;  %p1912_p7 = scmp.lt.s32.totalorder %s1670_s6, %s1670_s6 }
 0x226   :  { %1561 = vmatprep.subr.mxu0 %v1290_v16  ;;  %1632 = vmatprep.subr.mxu1 %v1354_v17  ;;  %p1908_p6 = scmp.ne.s32.totalorder %s1670_s6, %s1907_s13  ;;  %p1913_p8 = scmp.lt.s32.totalorder %s1907_s13, %s1907_s13 }
 0x227   :  { %1562 = vmatpush2.msra.mxu0 %v1289_v18  ;;  %1633 = vmatpush2.msra.mxu1 %v1353_v19 }
 0x228   :  { %1563 = vmatprep.subr.mxu0 %v1288_v20  ;;  %1634 = vmatprep.subr.mxu1 %v1352_v58  ;;  %p1914_p9 = por %p1913_p8, %p1912_p7 }
 0x229   :  { %1564 = vmatpush2.msra.mxu0 %v1287_v21  ;;  %1635 = vmatpush2.msra.mxu1 %v1351_v23 }
 0x22a   :  { %1565 = vmatprep.subr.mxu0 %v1286_v24  ;;  %1636 = vmatprep.subr.mxu1 %v1350_v25  ;;  %p1915_p10 = pnand %p1914_p9, %p1908_p6 }
 0x22b   :  { %1566 = vmatpush2.msra.mxu0 %v1285_v26  ;;  %1637 = vmatpush2.msra.mxu1 %v1349_v53 }
 0x22c   :  { %1567 = vmatprep.subr.mxu0 %v1284_v28  ;;  %1638 = vmatprep.subr.mxu1 %v1348_v32 }
 0x22d   :  { %1568 = vmatpush2.msra.mxu0 %v1283_v4  ;;  %1639 = vmatpush2.msra.mxu1 %v1347_v0 }
 0x22e   :  { %1569 = vmatprep.subr.mxu0 %v1282_v31  ;;  %1640 = vmatprep.subr.mxu1 %v1346_v1 }
 0x22f   :  { %1570 = vmatpush2.msra.mxu0 %v1281_v2  ;;  %1641 = vmatpush2.msra.mxu1 %v1345_v35 }
 0x230   :  { %1571 = vmatprep.subr.mxu0 %v1280_v36  ;;  %1642 = vmatprep.subr.mxu1 %v1344_v37 }
 0x231   :  { %1572 = vmatpush2.msra.mxu0 %v1279_v33  ;;  %1643 = vmatpush2.msra.mxu1 %v1343_v39 }
 0x232   :  { %1573 = vmatprep.subr.mxu0 %v1278_v40  ;;  %1644 = vmatprep.subr.mxu1 %v1342_v41 }
 0x233   :  { %1574 = vmatpush2.msra.mxu0 %v1277_v22  ;;  %1645 = vmatpush2.msra.mxu1 %v1341_v44 }
 0x234   :  { %1575 = vmatprep.subr.mxu0 %v1276_v49  ;;  %1646 = vmatprep.subr.mxu1 %v1340_v45 }
 0x235   :  { %1576 = vmatpush2.msra.mxu0 %v1275_v55  ;;  %1647 = vmatpush2.msra.mxu1 %v1339_v57 }
 0x236   :  { %1577 = vmatprep.subr.mxu0 %v1274_v59  ;;  %1648 = vmatprep.subr.mxu1 %v1338_v11 }
 0x237   :  { %1578 = vmatpush2.msra.mxu0 %v1273_v60  ;;  %1649 = vmatpush2.msra.mxu1 %v1337_v62 }
 0x238   :  { %1579 = vmatprep.subr.mxu0 %v1272_v63  ;;  %1650 = vmatprep.subr.mxu1 %v1336_v6 }
 0x239   :  { %1580 = vmatpush2.msra.mxu0 %v1271_v7  ;;  %1583 = vmatprep.mubr.f32.mxu0 %v1064_v3 }
 0x23a   :  { %1651 = vmatpush2.msra.mxu1 %v1335_v50  ;;  %1581 = vmatprep.subr.mxu0 %v1270_v9 }
 0x23b   :  { %1652 = vmatprep.subr.mxu1 %v1334_v10  ;;  %1582 = vmatpush2.msra.mxu0 %v1269_v34 }
 0x23c   :  { %1653 = vmatpush2.msra.mxu1 %v1333_v47  ;;  %1654 = vmatprep.mubr.f32.mxu1 %v1105_v12 }
 0x23d   :  { %1584 = vmatmul.mubr.f32.vlgmr.msra.gmra.mxu0 %v1062_v43  ;;  %1655 = vmatmul.mubr.f32.vlgmr.msra.gmra.mxu1 %v1103_v13 }
 0x2bc   :  { %v1443_v14 = vpop.f32.mrf.mxu0  ;;  %v1514_v17 = vpop.f32.mrf.mxu1 }
 0x2bd   :  { %v1444_v42 = vadd.f32 %v1443_v14, %v1370_v15 }
 0x2be   :  { %v1445_v16 = vpop.f32.mrf.mxu0  ;;  %v1516_v20 = vpop.f32.mrf.mxu1 }
 0x2bf   :  { %v1446_v18 = vadd.f32 %v1445_v16, %v1374_v46  ;;  %v1515_v19 = vadd.f32 %v1514_v17, %v1444_v42 }
 0x2c1   :  { %v1517_v21 = vadd.f32 %v1516_v20, %v1446_v18 }
 0x2fd   :  { %v1585_v58 = vpop.f32.mrf.mxu0  ;;  %v1656_v24 = vpop.f32.mrf.mxu1 }
 0x2fe   :  { %v1586_v23 = vadd.f32 %v1585_v58, %v1515_v19 }
 0x2ff   :  { %v1587_v25 = vpop.f32.mrf.mxu0  ;;  %v1658_v28 = vpop.f32.mrf.mxu1 }
 0x300   :  { %v1657_v26 = vadd.f32 %v1656_v24, %v1586_v23  ;;  %v1588_v53 = vadd.f32 %v1587_v25, %v1517_v21 }
 0x302   :  { %1661 = vst [vmem:[#allocation6] sm:$0xff] %v1657_v26  ;;  %v1659_v30 = vadd.f32 %v1658_v28, %v1588_v53 }
 0x304   :  { %1662 = vst [vmem:[#allocation6 + $0x8] sm:$0xff] %v1659_v30 }
 0x305   :  { %1918 = shalt.err (!%p1915_p10)
}
 0x306   :  { %1672 = dma.vmem_to_hbm [thread:$0]  %s1670_s6, 256, %s2973_s7, [#allocation5]  }
 0x307   :  { %1933 = dma.done.wait [#allocation5], 256  }
 0x308   :  { %1934 = vsyncadd [#allocation5], 4294967040 }
 0x309   :  { %1676 = vsyncpa [#allocation4], 1 }
 0x30a   :  { %1677 = vsyncpa [#allocation5], 1 }

</bundles_post_ra>
